<compile_context>
chip_gen: v5e
topology: v5e:2x2
jax: 0.10.0
libtpu: 0.0.40
codegen_flags: <defaults>
</compile_context>

<pallas_src>
from functools import lru_cache

import numpy as np
import jax
import jax.numpy as jnp
from jax.experimental import pallas as pl
from jax.experimental.pallas import tpu as pltpu

START_SCALE = 1
NUM_SCALES = 4
_TILE_N_CAP = 4           # samples (B*C) per grid step


# ----------------------------- Pallas kernel --------------------------------
def _make_kernel(num_scales):
    def kernel(diff_ref, rt_ref, bigl_ref, mask_ref, out_ref):
        # diff: (TILE_N*H, W)    rt: (W, Rtot)    bigl: (TILE_N*Ltot, TILE_N*H)
        # mask: (num_scales, TILE_N*Ltot, Rtot)   out: (1, 8, 128)
        y = jnp.dot(diff_ref[...], rt_ref[...],
                    preferred_element_type=jnp.float32)      # (TILE_N*H, Rtot)
        z = jnp.dot(bigl_ref[...], y,
                    preferred_element_type=jnp.float32)      # (TILE_N*Ltot, Rtot)

        # NaN masking matches the PyTorch module (divide by #finite elements).
        # TODO(synk): with actual NaNs present, the matmul formulation spreads
        # NaN over a wider footprint than the 3x3 conv; identical for finite inputs.
        finite = jnp.logical_not(jnp.isnan(z))
        absz = jnp.where(finite, jnp.abs(z), jnp.zeros_like(z))
        finf = finite.astype(jnp.float32)

        lane = jax.lax.broadcasted_iota(jnp.int32, (1, 128), 1)
        row = jnp.zeros((1, 128), jnp.float32)
        for s in range(num_scales):                          # tiny, unrolled
            m = mask_ref[s]                                  # (TILE_N*Ltot, Rtot)
            row = jnp.where(lane == s, jnp.sum(absz * m), row)
            row = jnp.where(lane == num_scales + s, jnp.sum(finf * m), row)
        out_ref[...] = jnp.broadcast_to(row, (1, 8, 128))
    return kernel


# ------------------------- parameter / matrix setup --------------------------
def _pool_matrix(n, k):
    m = n // k                       # AvgPool2d silently truncates the remainder
    A = np.zeros((m, n), np.float32)
    for i in range(m):
        A[i, i * k:(i + 1) * k] = 1.0 / k
    return A


def _smooth_matrix(m):               # [1, 2, 1] with replicate boundary
    S = np.zeros((m, m), np.float32)
    for i in range(m):
        S[i, max(i - 1, 0)] += 1.0
        S[i, i] += 2.0
        S[i, min(i + 1, m - 1)] += 1.0
    return S


def _deriv_matrix(m):                # [-1, 0, 1] with replicate boundary
    D = np.zeros((m, m), np.float32)
    for i in range(m):
        D[i, min(i + 1, m - 1)] += 1.0
        D[i, max(i - 1, 0)] -= 1.0
    return D


@lru_cache(maxsize=None)
def _build_constants(tile_n, H, W, start_scale, num_scales):
    L_groups, R_groups = [], []
    for s in range(num_scales):
        k = start_scale * 2 ** s
        Hs, Ws = H // k, W // k
        if Hs < 1 or Ws < 1:
            raise ValueError(f"pool size {k} larger than input ({H}x{W})")
        Ah, Aw = _pool_matrix(H, k), _pool_matrix(W, k)
        Sv, Dv = _smooth_matrix(Hs), _deriv_matrix(Hs)
        Sh, Dh = _smooth_matrix(Ws), _deriv_matrix(Ws)
        L_groups.append((Sv @ Ah) / 8.0)     # gx rows  (Hs, H)
        R_groups.append(Dh @ Aw)             # gx cols  (Ws, W)
        L_groups.append((Dv @ Ah) / 8.0)     # gy rows
        R_groups.append(Sh @ Aw)             # gy cols
    heights = [L.shape[0] for L in L_groups]
    widths = [R.shape[0] for R in R_groups]
    L_all = np.concatenate(L_groups, axis=0)                    # (Ltot, H)
    Rt_all = np.concatenate([R.T for R in R_groups], axis=1)    # (W, Rtot)
    Ltot, Rtot = L_all.shape[0], Rt_all.shape[1]
    BigL = np.kron(np.eye(tile_n, dtype=np.float32), L_all)     # block-diagonal

    row_off = np.concatenate([[0], np.cumsum(heights)])
    col_off = np.concatenate([[0], np.cumsum(widths)])
    masks = np.zeros((num_scales, tile_n * Ltot, Rtot), np.float32)
    for s in range(num_scales):
        for d in range(2):
            g = 2 * s + d
            r0, r1 = int(row_off[g]), int(row_off[g + 1])
            c0, c1 = int(col_off[g]), int(col_off[g + 1])
            for n in range(tile_n):
                masks[s, n * Ltot + r0:n * Ltot + r1, c0:c1] = 1.0
    return (jnp.asarray(Rt_all), jnp.asarray(BigL.astype(np.float32)),
            jnp.asarray(masks))


def _pick_tile_n(n, cap=_TILE_N_CAP):
    t = min(n, cap)
    while n % t:
        t -= 1
    return max(t, 1)


# ------------------------------ forward pass ---------------------------------
def multi_scale_gradient_loss(prediction, target,
                              start_scale=START_SCALE, num_scales=NUM_SCALES):
    pred = prediction[..., 0].astype(jnp.float32)
    targ = target[..., 0].astype(jnp.float32)
    B, C, H, W = targ.shape
    N = B * C
    diff = (pred - targ).reshape(N * H, W)        # diff computed exactly once

    tile_n = _pick_tile_n(N)
    num_tiles = N // tile_n
    rt, bigl, masks = _build_constants(tile_n, H, W, start_scale, num_scales)

    out = pl.pallas_call(
        _make_kernel(num_scales),
        grid=(num_tiles,),
        in_specs=[
            pl.BlockSpec((tile_n * H, W), lambda i: (i, 0)),
            pl.BlockSpec(rt.shape, lambda i: (0, 0)),
            pl.BlockSpec(bigl.shape, lambda i: (0, 0)),
            pl.BlockSpec(masks.shape, lambda i: (0, 0, 0)),
        ],
        out_specs=pl.BlockSpec((1, 8, 128), lambda i: (i, 0, 0)),
        out_shape=jax.ShapeDtypeStruct((num_tiles, 8, 128), jnp.float32),
        compiler_params=pltpu.CompilerParams(dimension_semantics=("parallel",)),
    )(diff, rt, bigl, masks)

    lanes = out[:, 0, :]                                     # (num_tiles, 128)
    sums = jnp.sum(lanes[:, :num_scales], axis=0)            # (num_scales,)
    cnts = jnp.sum(lanes[:, num_scales:2 * num_scales], axis=0)
    return jnp.sum(sums / cnts) * (2.0 * B) / num_scales


# ------------------------------ pure-JAX reference ---------------------------
def _reference_loss(prediction, target,
                    start_scale=START_SCALE, num_scales=NUM_SCALES):
    pred = prediction[..., 0]
    targ = target[..., 0]
    diff = pred - targ
    B, C, H, W = targ.shape
    x0 = diff.reshape(B * C, H, W)
    loss = 0.0
    for scale in range(num_scales):
        k = start_scale * 2 ** scale
        Hs, Ws = H // k, W // k
        x = x0.reshape(B * C, Hs, k, Ws, k).mean(axis=(2, 4))
        p = jnp.pad(x, ((0, 0), (1, 1), (1, 1)), mode="edge")

        def w(a, b):
            return p[:, a:a + Hs, b:b + Ws]

        gx = (-w(0, 0) + w(0, 2) - 2 * w(1, 0) + 2 * w(1, 2)
              - w(2, 0) + w(2, 2)) / 8.0
        gy = (-w(0, 0) - 2 * w(0, 1) - w(0, 2)
              + w(2, 0) + 2 * w(2, 1) + w(2, 2)) / 8.0
        delta = jnp.concatenate([gx, gy], axis=0)
        loss = loss + jnp.abs(delta).mean() * B * 2.0
    return loss / num_scales


if __name__ == "__main__":
    key = jax.random.PRNGKey(0)
    k1, k2 = jax.random.split(key)
    B, C, H, W, K = 2, 4, 16, 16, 2
    prediction = jax.random.normal(k1, (B, C, H, W, K), dtype=jnp.float32)
    target = jax.random.normal(k2, (B, C, H, W, K), dtype=jnp.float32)

    loss_fn = jax.jit(multi_scale_gradient_loss)
    loss = jax.block_until_ready(loss_fn(prediction, target))
    ref = jax.block_until_ready(_reference_loss(prediction, target))

    assert np.isfinite(float(loss))
    np.testing.assert_allclose(float(loss), float(ref), rtol=1e-4, atol=1e-5)
    print("KERNEL_OK")
</pallas_src>

<mosaic_0001>
module attributes {stable_mosaic.version = 11 : i64} {
  func.func @kernel(%arg0: i32, %arg1: memref<64x16xf32, #tpu.memory_space<vmem>>, %arg2: memref<16x60xf32, #tpu.memory_space<vmem>>, %arg3: memref<240x64xf32, #tpu.memory_space<vmem>>, %arg4: memref<4x240x60xf32, #tpu.memory_space<vmem>>, %arg5: memref<1x8x128xf32, #tpu.memory_space<vmem>>) attributes {dimension_semantics = [#tpu.dimension_semantics<parallel>], iteration_bounds = array<i64: 2>, scalar_prefetch = 0 : i64, scratch_operands = 0 : i64, tpu.core_type = #tpu.core_type<tc>, window_params = [{transform_indices = @transform_0, window_bounds = array<i64: 64, 16>}, {pipeline_mode = #tpu.pipeline_mode<synchronous>, transform_indices = @transform_1, window_bounds = array<i64: 16, 60>}, {pipeline_mode = #tpu.pipeline_mode<synchronous>, transform_indices = @transform_2, window_bounds = array<i64: 240, 64>}, {pipeline_mode = #tpu.pipeline_mode<synchronous>, transform_indices = @transform_3, window_bounds = array<i64: 4, 240, 60>}, {transform_indices = @transform_4, window_bounds = array<i64: 1, 8, 128>}]} {
    %c0 = arith.constant 0 : index
    %c0_0 = arith.constant 0 : index
    %0 = vector.load %arg1[%c0, %c0_0] : memref<64x16xf32, #tpu.memory_space<vmem>>, vector<64x16xf32>
    %c0_1 = arith.constant 0 : index
    %c0_2 = arith.constant 0 : index
    %1 = vector.load %arg2[%c0_1, %c0_2] : memref<16x60xf32, #tpu.memory_space<vmem>>, vector<16x60xf32>
    %cst = arith.constant dense<0.000000e+00> : vector<64x60xf32>
    %2 = tpu.matmul %0, %1, %cst {dimension_numbers = #tpu.dot_dimension_numbers<[1], [0], [0], [1], [0, 0, 1, 1], [], []>} : vector<64x16xf32>, vector<16x60xf32>, vector<64x60xf32> -> vector<64x60xf32>
    %c0_3 = arith.constant 0 : index
    %c0_4 = arith.constant 0 : index
    %3 = vector.load %arg3[%c0_3, %c0_4] : memref<240x64xf32, #tpu.memory_space<vmem>>, vector<240x64xf32>
    %cst_5 = arith.constant dense<0.000000e+00> : vector<240x60xf32>
    %4 = tpu.matmul %3, %2, %cst_5 {dimension_numbers = #tpu.dot_dimension_numbers<[1], [0], [0], [1], [0, 0, 1, 1], [], []>} : vector<240x64xf32>, vector<64x60xf32>, vector<240x60xf32> -> vector<240x60xf32>
    %5 = arith.cmpf one, %4, %4 : vector<240x60xf32>
    %cst_6 = arith.constant dense<true> : vector<240x60xi1>
    %6 = arith.xori %5, %cst_6 : vector<240x60xi1>
    %7 = math.absf %4 : vector<240x60xf32>
    %cst_7 = arith.constant 0.000000e+00 : f32
    %8 = vector.broadcast %cst_7 : f32 to vector<240x60xf32>
    %9 = arith.select %6, %7, %8 : vector<240x60xi1>, vector<240x60xf32>
    %10 = arith.extui %6 : vector<240x60xi1> to vector<240x60xi32>
    %11 = arith.sitofp %10 : vector<240x60xi32> to vector<240x60xf32>
    %12 = tpu.iota {dimensions = array<i32: 1>} : vector<1x128xi32>
    %cst_8 = arith.constant 0.000000e+00 : f32
    %13 = vector.broadcast %cst_8 : f32 to vector<1x128xf32>
    %c0_9 = arith.constant 0 : index
    %c0_10 = arith.constant 0 : index
    %c0_11 = arith.constant 0 : index
    %14 = vector.load %arg4[%c0_9, %c0_10, %c0_11] : memref<4x240x60xf32, #tpu.memory_space<vmem>>, vector<1x240x60xf32>
    %15 = vector.shape_cast %14 : vector<1x240x60xf32> to vector<240x60xf32>
    %c0_i32 = arith.constant 0 : i32
    %16 = vector.broadcast %c0_i32 : i32 to vector<1x128xi32>
    %17 = arith.cmpi eq, %12, %16 : vector<1x128xi32>
    %18 = arith.mulf %9, %15 : vector<240x60xf32>
    %19 = vector.shape_cast %18 : vector<240x60xf32> to vector<1x240x60xf32>
    %cst_12 = arith.constant dense<0.000000e+00> : vector<1xf32>
    %20 = vector.multi_reduction <add>, %19, %cst_12 [1, 2] : vector<1x240x60xf32> to vector<1xf32>
    %21 = vector.shape_cast %20 : vector<1xf32> to vector<1x1x1xf32>
    %22 = vector.extract %21[0, 0, 0] : f32 from vector<1x1x1xf32>
    %23 = vector.broadcast %22 : f32 to vector<1x128xf32>
    %24 = arith.select %17, %23, %13 : vector<1x128xi1>, vector<1x128xf32>
    %c4_i32 = arith.constant 4 : i32
    %25 = vector.broadcast %c4_i32 : i32 to vector<1x128xi32>
    %26 = arith.cmpi eq, %12, %25 : vector<1x128xi32>
    %27 = arith.mulf %11, %15 : vector<240x60xf32>
    %28 = vector.shape_cast %27 : vector<240x60xf32> to vector<1x240x60xf32>
    %cst_13 = arith.constant dense<0.000000e+00> : vector<1xf32>
    %29 = vector.multi_reduction <add>, %28, %cst_13 [1, 2] : vector<1x240x60xf32> to vector<1xf32>
    %30 = vector.shape_cast %29 : vector<1xf32> to vector<1x1x1xf32>
    %31 = vector.extract %30[0, 0, 0] : f32 from vector<1x1x1xf32>
    %32 = vector.broadcast %31 : f32 to vector<1x128xf32>
    %33 = arith.select %26, %32, %24 : vector<1x128xi1>, vector<1x128xf32>
    %c1 = arith.constant 1 : index
    %c0_14 = arith.constant 0 : index
    %c0_15 = arith.constant 0 : index
    %34 = vector.load %arg4[%c1, %c0_14, %c0_15] : memref<4x240x60xf32, #tpu.memory_space<vmem>>, vector<1x240x60xf32>
    %35 = vector.shape_cast %34 : vector<1x240x60xf32> to vector<240x60xf32>
    %c1_i32 = arith.constant 1 : i32
    %36 = vector.broadcast %c1_i32 : i32 to vector<1x128xi32>
    %37 = arith.cmpi eq, %12, %36 : vector<1x128xi32>
    %38 = arith.mulf %9, %35 : vector<240x60xf32>
    %39 = vector.shape_cast %38 : vector<240x60xf32> to vector<1x240x60xf32>
    %cst_16 = arith.constant dense<0.000000e+00> : vector<1xf32>
    %40 = vector.multi_reduction <add>, %39, %cst_16 [1, 2] : vector<1x240x60xf32> to vector<1xf32>
    %41 = vector.shape_cast %40 : vector<1xf32> to vector<1x1x1xf32>
    %42 = vector.extract %41[0, 0, 0] : f32 from vector<1x1x1xf32>
    %43 = vector.broadcast %42 : f32 to vector<1x128xf32>
    %44 = arith.select %37, %43, %33 : vector<1x128xi1>, vector<1x128xf32>
    %c5_i32 = arith.constant 5 : i32
    %45 = vector.broadcast %c5_i32 : i32 to vector<1x128xi32>
    %46 = arith.cmpi eq, %12, %45 : vector<1x128xi32>
    %47 = arith.mulf %11, %35 : vector<240x60xf32>
    %48 = vector.shape_cast %47 : vector<240x60xf32> to vector<1x240x60xf32>
    %cst_17 = arith.constant dense<0.000000e+00> : vector<1xf32>
    %49 = vector.multi_reduction <add>, %48, %cst_17 [1, 2] : vector<1x240x60xf32> to vector<1xf32>
    %50 = vector.shape_cast %49 : vector<1xf32> to vector<1x1x1xf32>
    %51 = vector.extract %50[0, 0, 0] : f32 from vector<1x1x1xf32>
    %52 = vector.broadcast %51 : f32 to vector<1x128xf32>
    %53 = arith.select %46, %52, %44 : vector<1x128xi1>, vector<1x128xf32>
    %c2 = arith.constant 2 : index
    %c0_18 = arith.constant 0 : index
    %c0_19 = arith.constant 0 : index
    %54 = vector.load %arg4[%c2, %c0_18, %c0_19] : memref<4x240x60xf32, #tpu.memory_space<vmem>>, vector<1x240x60xf32>
    %55 = vector.shape_cast %54 : vector<1x240x60xf32> to vector<240x60xf32>
    %c2_i32 = arith.constant 2 : i32
    %56 = vector.broadcast %c2_i32 : i32 to vector<1x128xi32>
    %57 = arith.cmpi eq, %12, %56 : vector<1x128xi32>
    %58 = arith.mulf %9, %55 : vector<240x60xf32>
    %59 = vector.shape_cast %58 : vector<240x60xf32> to vector<1x240x60xf32>
    %cst_20 = arith.constant dense<0.000000e+00> : vector<1xf32>
    %60 = vector.multi_reduction <add>, %59, %cst_20 [1, 2] : vector<1x240x60xf32> to vector<1xf32>
    %61 = vector.shape_cast %60 : vector<1xf32> to vector<1x1x1xf32>
    %62 = vector.extract %61[0, 0, 0] : f32 from vector<1x1x1xf32>
    %63 = vector.broadcast %62 : f32 to vector<1x128xf32>
    %64 = arith.select %57, %63, %53 : vector<1x128xi1>, vector<1x128xf32>
    %c6_i32 = arith.constant 6 : i32
    %65 = vector.broadcast %c6_i32 : i32 to vector<1x128xi32>
    %66 = arith.cmpi eq, %12, %65 : vector<1x128xi32>
    %67 = arith.mulf %11, %55 : vector<240x60xf32>
    %68 = vector.shape_cast %67 : vector<240x60xf32> to vector<1x240x60xf32>
    %cst_21 = arith.constant dense<0.000000e+00> : vector<1xf32>
    %69 = vector.multi_reduction <add>, %68, %cst_21 [1, 2] : vector<1x240x60xf32> to vector<1xf32>
    %70 = vector.shape_cast %69 : vector<1xf32> to vector<1x1x1xf32>
    %71 = vector.extract %70[0, 0, 0] : f32 from vector<1x1x1xf32>
    %72 = vector.broadcast %71 : f32 to vector<1x128xf32>
    %73 = arith.select %66, %72, %64 : vector<1x128xi1>, vector<1x128xf32>
    %c3 = arith.constant 3 : index
    %c0_22 = arith.constant 0 : index
    %c0_23 = arith.constant 0 : index
    %74 = vector.load %arg4[%c3, %c0_22, %c0_23] : memref<4x240x60xf32, #tpu.memory_space<vmem>>, vector<1x240x60xf32>
    %75 = vector.shape_cast %74 : vector<1x240x60xf32> to vector<240x60xf32>
    %c3_i32 = arith.constant 3 : i32
    %76 = vector.broadcast %c3_i32 : i32 to vector<1x128xi32>
    %77 = arith.cmpi eq, %12, %76 : vector<1x128xi32>
    %78 = arith.mulf %9, %75 : vector<240x60xf32>
    %79 = vector.shape_cast %78 : vector<240x60xf32> to vector<1x240x60xf32>
    %cst_24 = arith.constant dense<0.000000e+00> : vector<1xf32>
    %80 = vector.multi_reduction <add>, %79, %cst_24 [1, 2] : vector<1x240x60xf32> to vector<1xf32>
    %81 = vector.shape_cast %80 : vector<1xf32> to vector<1x1x1xf32>
    %82 = vector.extract %81[0, 0, 0] : f32 from vector<1x1x1xf32>
    %83 = vector.broadcast %82 : f32 to vector<1x128xf32>
    %84 = arith.select %77, %83, %73 : vector<1x128xi1>, vector<1x128xf32>
    %c7_i32 = arith.constant 7 : i32
    %85 = vector.broadcast %c7_i32 : i32 to vector<1x128xi32>
    %86 = arith.cmpi eq, %12, %85 : vector<1x128xi32>
    %87 = arith.mulf %11, %75 : vector<240x60xf32>
    %88 = vector.shape_cast %87 : vector<240x60xf32> to vector<1x240x60xf32>
    %cst_25 = arith.constant dense<0.000000e+00> : vector<1xf32>
    %89 = vector.multi_reduction <add>, %88, %cst_25 [1, 2] : vector<1x240x60xf32> to vector<1xf32>
    %90 = vector.shape_cast %89 : vector<1xf32> to vector<1x1x1xf32>
    %91 = vector.extract %90[0, 0, 0] : f32 from vector<1x1x1xf32>
    %92 = vector.broadcast %91 : f32 to vector<1x128xf32>
    %93 = arith.select %86, %92, %84 : vector<1x128xi1>, vector<1x128xf32>
    %94 = vector.shape_cast %93 : vector<1x128xf32> to vector<1x1x128xf32>
    %95 = vector.broadcast %94 : vector<1x1x128xf32> to vector<1x8x128xf32>
    %c0_26 = arith.constant 0 : index
    %c0_27 = arith.constant 0 : index
    %c0_28 = arith.constant 0 : index
    %96 = vector.load %arg5[%c0_26, %c0_27, %c0_28] : memref<1x8x128xf32, #tpu.memory_space<vmem>>, vector<1x8x128xf32>
    tpu.vector_store %arg5[%c0_26, %c0_27, %c0_28], %95 {strides = array<i32>} : memref<1x8x128xf32, #tpu.memory_space<vmem>>, vector<1x8x128xf32>,
    return
  }
  func.func @transform_0(%arg0: i32) -> (i32, i32) {
    %c0_i32 = arith.constant 0 : i32
    %c0_i32_0 = arith.constant 0 : i32
    return %arg0, %c0_i32 : i32, i32
  }
  func.func @transform_1(%arg0: i32) -> (i32, i32) {
    %c0_i32 = arith.constant 0 : i32
    %c0_i32_0 = arith.constant 0 : i32
    %c0_i32_1 = arith.constant 0 : i32
    return %c0_i32, %c0_i32_0 : i32, i32
  }
  func.func @transform_2(%arg0: i32) -> (i32, i32) {
    %c0_i32 = arith.constant 0 : i32
    %c0_i32_0 = arith.constant 0 : i32
    %c0_i32_1 = arith.constant 0 : i32
    return %c0_i32, %c0_i32_0 : i32, i32
  }
  func.func @transform_3(%arg0: i32) -> (i32, i32, i32) {
    %c0_i32 = arith.constant 0 : i32
    %c0_i32_0 = arith.constant 0 : i32
    %c0_i32_1 = arith.constant 0 : i32
    %c0_i32_2 = arith.constant 0 : i32
    return %c0_i32, %c0_i32_0, %c0_i32_1 : i32, i32, i32
  }
  func.func @transform_4(%arg0: i32) -> (i32, i32, i32) {
    %c0_i32 = arith.constant 0 : i32
    %c0_i32_0 = arith.constant 0 : i32
    %c0_i32_1 = arith.constant 0 : i32
    return %arg0, %c0_i32, %c0_i32_0 : i32, i32, i32
  }
}

</mosaic_0001>

<bundles_post_ra>
// kernel: multi_scale_gradient_loss.1
= control target key start
LH: loop header
LB: loop body
LE: loop exit
PB: predicated region body
PF: predicated region fallthrough
CT: control target
= control target key end

     0   :  { %9 = vsyncpa [#allocation3], 0  ;;  %s1914_s15 = smov 0   ;;  %s3072_s0 = inlined_call_operand.vmem [shape: f32[128,16], index: 0, kind: input, shape index: {}]   ;;  %s3073_s1 = inlined_call_operand.vmem [shape: f32[16,60], index: 1, kind: input, shape index: {}]   ;;  %s3074_s2 = inlined_call_operand.vmem [shape: f32[240,64], index: 2, kind: input, shape index: {}]   ;;  %s3075_s3 = inlined_call_operand.hbm [shape: f32[4,240,60], index: 3, kind: input, shape index: {}]   ;;  %s3076_s4 = inlined_call_operand.vmem [shape: f32[2,8,128], index: 4, kind: output, shape index: {}]  }
   0x1 LB: > { %s152_s18 = sshll.u32 %s3075_s3, 4  ;;  %s1923_s19 = sadd.s32 4294967295, %s1882_s15   ;;  %s1882_s15 = sphi %s1914_s15, %s15_s15   ;;  %s153_s18 = int_to_ptr.hbm [resolvable:$true] %s152_s18 }
   0x2   : > { %p1701_p0 = scmp.ge.s32.totalorder %s1882_s15, 1  ;;  %p135_p1 = scmp.lt.s32.totalorder %s1882_s15, 3 }
   0x3   : > { %p1827_p2 = scmp.eq.s32.totalorder %s1923_s19, 0  ;;  %s1884_s20 = smov [#allocation2]  }
   0x4   : > { %p136_p3 = pnand %p1701_p0, %p135_p1  ;;  %s154_s21 = sshll.u32 %s1884_s20, 4  ;;  %s155_s21 = int_to_ptr.vmem [resolvable:$true] %s154_s21 }
   0x5   : > { %s1885_s22 = smov 128   ;;  %s1886_s23 = smov 8  }
   0x6   : > { %p1823_p4 = pneg %p136_p3  ;;  %179 = sbr.rel (%p136_p3) target bundleno = 743 (0x2e7), region = 36 }
   0x8   : > { %p1824_p5 = pnand %p1827_p2, %p1823_p4 }
   0xa   : > { %1826 = dma.hbm_to_vmem [thread:$0]  (!%p1824_p5), %s153_s18, 15360, %s155_s21, [#allocation3], %s1885_s22, %s1885_s22, %s1886_s23  }
   0xb   : > { %1877 = dma.done.wait (%p1827_p2), [#allocation3], 15360  }
   0xc   : > { %1879 = vsyncadd (%p1827_p2), [#allocation3], 4294951936  ;;  %s1706_s24 = sshll.u32 %s1923_s19, 3  ;;  %v224_v0 = vld [vmem:[%s3073_s1 + $0x8] sm:$0xff]  ;;  %v223_v1 = vld [vmem:[%s3073_s1] sm:$0xff]  ;;  %vm225_vm0 = vcmask 130048  }
   0xd   : > { %p206_p6 = scmp.lt.s32.totalorder %s1706_s24, 15  ;;  %264 = vmatpush.msra.mxu0 %v224_v0  ;;  %v292_v18 = vld [vmem:[%s3074_s2 + $0x8] sm:$0xff]  ;;  %vm321_vm1 = vcmask 523264   ;;  %v291_v19 = vld [vmem:[%s3074_s2] sm:$0xff]  ;;  %v301_v20 = vld [vmem:[%s3074_s2 + $0x50] sm:$0xff]  ;;  %vm1887_vm3 = vmmov 1  }
   0xe   : > { %v311_v21 = vld [vmem:[%s3074_s2 + $0xa0] sm:$0xff]  ;;  %v293_v22 = vld [vmem:[%s3074_s2 + $0x10] sm:$0xff]  ;;  %v302_v23 = vld [vmem:[%s3074_s2 + $0x58] sm:$0xff]  ;;  %v3077_v52 = vmov 0.0   ;;  %vm762_vm7 = vcmask 490496   ;;  %p211_p7 = scmp.lt.s32.totalorder %s1923_s19, 1 }
   0xf   : > { %s3224_s24 = smov (!%p206_p6, %s1706_s24), 15  ;;  %265 = vmatpush.msra.mxu0 %v223_v1  ;;  %v312_v24 = vld [vmem:[%s3074_s2 + $0xa8] sm:$0xff]  ;;  %v294_v25 = vld [vmem:[%s3074_s2 + $0x18] sm:$0xff]  ;;  %v303_v26 = vld [vmem:[%s3074_s2 + $0x60] sm:$0xff] }
  0x10   : > { %s1707_s25 = sshll.u32 %s3224_s24, 3  ;;  %v313_v27 = vld [vmem:[%s3074_s2 + $0xb0] sm:$0xff]  ;;  %v295_v28 = vld [vmem:[%s3074_s2 + $0x20] sm:$0xff]  ;;  %v304_v29 = vld [vmem:[%s3074_s2 + $0x68] sm:$0xff]  ;;  %s3226_s19 = smov (!%p211_p7, %s1923_s19), 1 }
  0x11   : > { %s209_s28 = scalar_lea.vmem %s3072_s0, %s1707_s25  ;;  %v314_v30 = vld [vmem:[%s3074_s2 + $0xb8] sm:$0xff]  ;;  %v296_v31 = vld [vmem:[%s3074_s2 + $0x28] sm:$0xff]  ;;  %v305_v32 = vld [vmem:[%s3074_s2 + $0x70] sm:$0xff]  ;;  %s1708_s27 = sshll.u32 %s3226_s19, 3 }
  0x12   : > { %v215_v2 = vld [vmem:[%s209_s28] sm:$0xff]  ;;  %v216_v3 = vld [vmem:[%s209_s28 + $0x8] sm:$0xff]  ;;  %v217_v4 = vld [vmem:[%s209_s28 + $0x10] sm:$0xff]  ;;  %s214_s5 = scalar_lea.vmem %s3076_s4, %s1708_s27 }
  0x13   : > { %1709 = vmatmul.msk.f32.vlgmr.msra.gmra.mxu0 %vm225_vm0, %v215_v2  ;;  %v218_v5 = vld [vmem:[%s209_s28 + $0x18] sm:$0xff]  ;;  %v219_v6 = vld [vmem:[%s209_s28 + $0x20] sm:$0xff]  ;;  %v220_v7 = vld [vmem:[%s209_s28 + $0x28] sm:$0xff] }
  0x14   : > { %v221_v8 = vld [vmem:[%s209_s28 + $0x30] sm:$0xff]  ;;  %v222_v9 = vld [vmem:[%s209_s28 + $0x38] sm:$0xff]  ;;  %v315_v33 = vld [vmem:[%s3074_s2 + $0xc0] sm:$0xff] }
  0x15   : > { %v297_v34 = vld [vmem:[%s3074_s2 + $0x30] sm:$0xff]  ;;  %v306_v35 = vld [vmem:[%s3074_s2 + $0x78] sm:$0xff]  ;;  %v316_v36 = vld [vmem:[%s3074_s2 + $0xc8] sm:$0xff] }
  0x16   : > { %v298_v37 = vld [vmem:[%s3074_s2 + $0x38] sm:$0xff]  ;;  %v307_v38 = vld [vmem:[%s3074_s2 + $0x80] sm:$0xff]  ;;  %v317_v39 = vld [vmem:[%s3074_s2 + $0xd0] sm:$0xff] }
  0x17   : > { %v299_v40 = vld [vmem:[%s3074_s2 + $0x40] sm:$0xff]  ;;  %v308_v41 = vld [vmem:[%s3074_s2 + $0x88] sm:$0xff]  ;;  %v318_v42 = vld [vmem:[%s3074_s2 + $0xd8] sm:$0xff] }
  0x18   : > { %v300_v43 = vld [vmem:[%s3074_s2 + $0x48] sm:$0xff]  ;;  %v309_v44 = vld [vmem:[%s3074_s2 + $0x90] sm:$0xff]  ;;  %v319_v45 = vld [vmem:[%s3074_s2 + $0xe0] sm:$0xff] }
  0x19   : > { %v310_v46 = vld [vmem:[%s3074_s2 + $0x98] sm:$0xff]  ;;  %v320_v47 = vld [vmem:[%s3074_s2 + $0xe8] sm:$0xff]  ;;  %v701_v58 = vld [vmem:[#allocation2] sm:$0xff] }
  0x1a   : > { %v702_v54 = vld [vmem:[#allocation2 + $0x8] sm:$0xff]  ;;  %v936_v55 = vld [vmem:[#allocation2 + $0xf8] sm:$0xff]  ;;  %v935_v59 = vld [vmem:[#allocation2 + $0xf0] sm:$0xff] }
  0x1b   : > { %1710 = vmatmul.msk.f32.gmra.mxu0 %vm225_vm0, %v216_v3  ;;  %v1169_v57 = vld [vmem:[#allocation2 + $0x1e8] sm:$0xff]  ;;  %v1402_v0 = vld [vmem:[#allocation2 + $0x2d8] sm:$0xff] }
  0x23   : > { %1711 = vmatmul.msk.f32.gmra.mxu0 %vm225_vm0, %v217_v4 }
  0x2b   : > { %1712 = vmatmul.msk.f32.gmra.mxu0 %vm225_vm0, %v218_v5 }
  0x33   : > { %1713 = vmatmul.msk.f32.gmra.mxu0 %vm225_vm0, %v219_v6 }
  0x3b   : > { %1714 = vmatmul.msk.f32.gmra.mxu0 %vm225_vm0, %v220_v7 }
  0x43   : > { %1715 = vmatmul.msk.f32.gmra.mxu0 %vm225_vm0, %v221_v8 }
  0x4b   : > { %1716 = vmatmul.msk.f32.gmra.mxu0 %vm225_vm0, %v222_v9 }
  0x90   : > { %v267_v10 = vpop.f32.mrf.mxu0 }
  0x98   : > { %v270_v11 = vpop.f32.mrf.mxu0 }
  0xa0   : > { %v273_v12 = vpop.f32.mrf.mxu0 }
  0xa8   : > { %v276_v13 = vpop.f32.mrf.mxu0 }
  0xb0   : > { %v279_v14 = vpop.f32.mrf.mxu0 }
  0xb8   : > { %v282_v15 = vpop.f32.mrf.mxu0 }
  0xc0   : > { %v285_v16 = vpop.f32.mrf.mxu0 }
  0xc8   : > { %v288_v17 = vpop.f32.mrf.mxu0 }
  0xc9   : > { %420 = vmatpush.msrb.mxu0 %v288_v17  ;;  %1779 = vmatpush.msra.mxu1 %v288_v17 }
  0xca   : > { %1780 = vmatpush.msra.mxu2 %v288_v17  ;;  %1781 = vmatpush.msra.mxu3 %v288_v17  ;;  %v1401_v17 = vld [vmem:[#allocation2 + $0x2d0] sm:$0xff] }
  0xcb   : > { %421 = vmatpush.msrb.mxu0 %v285_v16  ;;  %1782 = vmatpush.msra.mxu1 %v285_v16 }
  0xcc   : > { %1783 = vmatpush.msra.mxu2 %v285_v16  ;;  %1784 = vmatpush.msra.mxu3 %v285_v16 }
  0xcd   : > { %422 = vmatpush.msrb.mxu0 %v282_v15  ;;  %1785 = vmatpush.msra.mxu1 %v282_v15 }
  0xce   : > { %1786 = vmatpush.msra.mxu2 %v282_v15  ;;  %1787 = vmatpush.msra.mxu3 %v282_v15 }
  0xcf   : > { %423 = vmatpush.msrb.mxu0 %v279_v14  ;;  %1788 = vmatpush.msra.mxu1 %v279_v14 }
  0xd0   : > { %1789 = vmatpush.msra.mxu2 %v279_v14  ;;  %1790 = vmatpush.msra.mxu3 %v279_v14 }
  0xd1   : > { %424 = vmatpush.msrb.mxu0 %v276_v13  ;;  %1791 = vmatpush.msra.mxu1 %v276_v13 }
  0xd2   : > { %1792 = vmatpush.msra.mxu2 %v276_v13  ;;  %1793 = vmatpush.msra.mxu3 %v276_v13 }
  0xd3   : > { %425 = vmatpush.msrb.mxu0 %v273_v12  ;;  %1794 = vmatpush.msra.mxu1 %v273_v12 }
  0xd4   : > { %1795 = vmatpush.msra.mxu2 %v273_v12  ;;  %1796 = vmatpush.msra.mxu3 %v273_v12  ;;  %v1168_v12 = vld [vmem:[#allocation2 + $0x1e0] sm:$0xff] }
  0xd5   : > { %426 = vmatpush.msrb.mxu0 %v270_v11  ;;  %1797 = vmatpush.msra.mxu1 %v270_v11 }
  0xd6   : > { %1798 = vmatpush.msra.mxu2 %v270_v11  ;;  %1799 = vmatpush.msra.mxu3 %v270_v11 }
  0xd7   : > { %427 = vmatpush.msrb.mxu0 %v267_v10  ;;  %1800 = vmatpush.msra.mxu1 %v267_v10 }
  0xd8   : > { %1801 = vmatpush.msra.mxu2 %v267_v10  ;;  %1802 = vmatpush.msra.mxu3 %v267_v10 }
  0xd9   : > { %1718 = vmatmul.msk.f32.vlgmr.msra.gmra.mxu1 %vm321_vm1, %v292_v18  ;;  %1717 = vmatmul.msk.f32.vlgmr.msrb.gmra.mxu0 %vm321_vm1, %v291_v19 }
  0xda   : > { %1727 = vmatmul.msk.f32.vlgmr.msra.gmra.mxu2 %vm321_vm1, %v301_v20  ;;  %1737 = vmatmul.msk.f32.vlgmr.msra.gmra.mxu3 %vm321_vm1, %v311_v21 }
  0xe1   : > { %1719 = vmatmul.msk.f32.gmra.mxu1 %vm321_vm1, %v293_v22 }
  0xe2   : > { %1728 = vmatmul.msk.f32.gmra.mxu2 %vm321_vm1, %v302_v23  ;;  %1738 = vmatmul.msk.f32.gmra.mxu3 %vm321_vm1, %v312_v24 }
  0xe9   : > { %1720 = vmatmul.msk.f32.gmra.mxu1 %vm321_vm1, %v294_v25 }
  0xea   : > { %1729 = vmatmul.msk.f32.gmra.mxu2 %vm321_vm1, %v303_v26  ;;  %1739 = vmatmul.msk.f32.gmra.mxu3 %vm321_vm1, %v313_v27 }
  0xf1   : > { %1721 = vmatmul.msk.f32.gmra.mxu1 %vm321_vm1, %v295_v28 }
  0xf2   : > { %1730 = vmatmul.msk.f32.gmra.mxu2 %vm321_vm1, %v304_v29  ;;  %1740 = vmatmul.msk.f32.gmra.mxu3 %vm321_vm1, %v314_v30 }
  0xf9   : > { %1722 = vmatmul.msk.f32.gmra.mxu1 %vm321_vm1, %v296_v31  ;;  %v703_v31 = vld [vmem:[#allocation2 + $0x10] sm:$0xff] }
  0xfa   : > { %1731 = vmatmul.msk.f32.gmra.mxu2 %vm321_vm1, %v305_v32  ;;  %1741 = vmatmul.msk.f32.gmra.mxu3 %vm321_vm1, %v315_v33 }
 0x101   : > { %1723 = vmatmul.msk.f32.gmra.mxu1 %vm321_vm1, %v297_v34 }
 0x102   : > { %1732 = vmatmul.msk.f32.gmra.mxu2 %vm321_vm1, %v306_v35  ;;  %1742 = vmatmul.msk.f32.gmra.mxu3 %vm321_vm1, %v316_v36 }
 0x109   : > { %1724 = vmatmul.msk.f32.gmra.mxu1 %vm321_vm1, %v298_v37 }
 0x10a   : > { %1733 = vmatmul.msk.f32.gmra.mxu2 %vm321_vm1, %v307_v38  ;;  %1743 = vmatmul.msk.f32.gmra.mxu3 %vm321_vm1, %v317_v39  ;;  %v937_v38 = vld [vmem:[#allocation2 + $0x100] sm:$0xff] }
 0x111   : > { %1725 = vmatmul.msk.f32.gmra.mxu1 %vm321_vm1, %v299_v40 }
 0x112   : > { %1734 = vmatmul.msk.f32.gmra.mxu2 %vm321_vm1, %v308_v41  ;;  %1744 = vmatmul.msk.f32.gmra.mxu3 %vm321_vm1, %v318_v42 }
 0x119   : > { %1726 = vmatmul.msk.f32.gmra.mxu1 %vm321_vm1, %v300_v43  ;;  %v1170_v43 = vld [vmem:[#allocation2 + $0x1f0] sm:$0xff] }
 0x11a   : > { %1735 = vmatmul.msk.f32.gmra.mxu2 %vm321_vm1, %v309_v44  ;;  %1745 = vmatmul.msk.f32.gmra.mxu3 %vm321_vm1, %v319_v45  ;;  %v1403_v44 = vld [vmem:[#allocation2 + $0x2e0] sm:$0xff] }
 0x122   : > { %1736 = vmatmul.msk.f32.gmra.mxu2 %vm321_vm1, %v310_v46  ;;  %1746 = vmatmul.msk.f32.gmra.mxu3 %vm321_vm1, %v320_v47 }
 0x156   : > { %v432_v48 = vpop.f32.mrf.mxu1  ;;  %v429_v49 = vpop.f32.mrf.mxu0 }
 0x157   : > { %vm520_vm2 = vcmp.ne.f32.partialorder %v432_v48, %v432_v48  ;;  %v580_v50 = vand.u32 2147483647, %v432_v48  ;;  %vm519_vm5 = vcmp.ne.f32.partialorder %v429_v49, %v429_v49  ;;  %v579_v56 = vand.u32 2147483647, %v429_v49 }
 0x158   : > { %vm550_vm4 = vmxor %vm520_vm2, %vm1887_vm3 }
 0x159   : > { %v610_v51 = vsel %vm550_vm4, %v580_v50, 0.0  ;;  %v1748_v53 = vsel %vm550_vm4, 1.0, %v3077_v52  ;;  %vm549_vm6 = vmxor %vm519_vm5, %vm1887_vm3 }
 0x15a   : > { %v733_v60 = vmul.f32 %v702_v54, %v610_v51  ;;  %v835_v61 = vmul.f32 %v1748_v53, %v702_v54  ;;  %v967_v62 = vmul.f32 %v936_v55, %v610_v51  ;;  %v1068_v63 = vmul.f32 %v1748_v53, %v936_v55  ;;  %v711_v54 = vld [vmem:[#allocation2 + $0x50] sm:$0xff] }
 0x15b   : > { %v1200_v1 = vmul.f32 %v1169_v57, %v610_v51  ;;  %v1301_v2 = vmul.f32 %v1748_v53, %v1169_v57  ;;  %v609_v3 = vsel %vm549_vm6, %v579_v56, 0.0  ;;  %v1747_v4 = vsel %vm549_vm6, 1.0, %v3077_v52 }
 0x15c   : > { %v732_v5 = vmul.f32 %v701_v58, %v609_v3  ;;  %v834_v6 = vmul.f32 %v1747_v4, %v701_v58  ;;  %v966_v7 = vmul.f32 %v935_v59, %v609_v3  ;;  %v1433_v10 = vmul.f32 %v1402_v0, %v610_v51 }
 0x15d   : > { %v459_v9 = vpop.f32.mrf.mxu2  ;;  %v1067_v11 = vmul.f32 %v1747_v4, %v935_v59  ;;  %v764_v13 = vsel %vm762_vm7, %v733_v60, 0.0  ;;  %v865_v14 = vsel %vm762_vm7, %v835_v61, 0.0  ;;  %v997_v15 = vsel %vm762_vm7, %v967_v62, 0.0  ;;  %v945_v60 = vld [vmem:[#allocation2 + $0x140] sm:$0xff] }
 0x15e   : > { %v435_v8 = vpop.f32.mrf.mxu1  ;;  %v1534_v16 = vmul.f32 %v1748_v53, %v1402_v0  ;;  %v1098_v18 = vsel %vm762_vm7, %v1068_v63, 0.0  ;;  %v1230_v19 = vsel %vm762_vm7, %v1200_v1, 0.0  ;;  %v1331_v20 = vsel %vm762_vm7, %v1301_v2, 0.0 }
 0x15f   : > { %vm529_vm8 = vcmp.ne.f32.partialorder %v459_v9, %v459_v9  ;;  %v763_v21 = vsel %vm762_vm7, %v732_v5, 0.0  ;;  %v864_v22 = vsel %vm762_vm7, %v834_v6, 0.0  ;;  %v996_v23 = vsel %vm762_vm7, %v966_v7, 0.0  ;;  %v1178_v5 = vld [vmem:[#allocation2 + $0x230] sm:$0xff] }
 0x160   : > { %v1199_v24 = vmul.f32 %v1168_v12, %v609_v3  ;;  %v1097_v25 = vsel %vm762_vm7, %v1067_v11, 0.0  ;;  %v1300_v26 = vmul.f32 %v1747_v4, %v1168_v12  ;;  %v1432_v27 = vmul.f32 %v1401_v17, %v609_v3  ;;  %vm2082_vm10 = vmxor %vm529_vm8, %vm1887_vm3 }
 0x161   : > { %v1533_v28 = vmul.f32 %v1747_v4, %v1401_v17  ;;  %v1463_v29 = vsel %vm762_vm7, %v1433_v10, 0.0  ;;  %vm521_vm9 = vcmp.ne.f32.partialorder %v435_v8, %v435_v8  ;;  %v581_v30 = vand.u32 2147483647, %v435_v8 }
 0x162   : > { %v589_v33 = vand.u32 2147483647, %v459_v9  ;;  %v1564_v34 = vsel %vm762_vm7, %v1534_v16, 0.0  ;;  %v765_v35 = vadd.f32 %v764_v13, %v763_v21  ;;  %v866_v36 = vadd.f32 %v865_v14, %v864_v22  ;;  %vm551_vm11 = vmxor %vm521_vm9, %vm1887_vm3  ;;  %v1411_v21 = vld [vmem:[#allocation2 + $0x320] sm:$0xff] }
 0x163   : > { %v998_v37 = vadd.f32 %v997_v15, %v996_v23  ;;  %v1099_v39 = vadd.f32 %v1098_v18, %v1097_v25  ;;  %v1229_v40 = vsel %vm762_vm7, %v1199_v24, 0.0  ;;  %v611_v41 = vsel %vm551_vm11, %v581_v30, 0.0  ;;  %v704_v23 = vld [vmem:[#allocation2 + $0x18] sm:$0xff] }
 0x164   : > { %v1749_v42 = vsel %vm551_vm11, 1.0, %v3077_v52  ;;  %v1330_v45 = vsel %vm762_vm7, %v1300_v26, 0.0  ;;  %v1462_v46 = vsel %vm762_vm7, %v1432_v27, 0.0  ;;  %v1563_v47 = vsel %vm762_vm7, %v1533_v28, 0.0  ;;  %v938_v28 = vld [vmem:[#allocation2 + $0x108] sm:$0xff] }
 0x165   : > { %v734_v48 = vmul.f32 %v703_v31, %v611_v41  ;;  %v836_v49 = vmul.f32 %v1749_v42, %v703_v31  ;;  %v968_v50 = vmul.f32 %v937_v38, %v611_v41  ;;  %v619_v51 = vsel %vm2082_vm10, %v589_v33, 0.0  ;;  %v2099_v6 = vpop.f32.mrf.mxu2  ;;  %v1171_v33 = vld [vmem:[#allocation2 + $0x1f8] sm:$0xff] }
 0x166   : > { %v1757_v53 = vsel %vm2082_vm10, 1.0, %v3077_v52  ;;  %v438_v55 = vpop.f32.mrf.mxu1  ;;  %v1069_v56 = vmul.f32 %v1749_v42, %v937_v38  ;;  %v1201_v57 = vmul.f32 %v1170_v43, %v611_v41  ;;  %v1302_v58 = vmul.f32 %v1749_v42, %v1170_v43 }
 0x167   : > { %v1434_v59 = vmul.f32 %v1403_v44, %v611_v41  ;;  %v1231_v61 = vadd.f32 %v1230_v19, %v1229_v40  ;;  %v1332_v62 = vadd.f32 %v1331_v20, %v1330_v45  ;;  %v1464_v63 = vadd.f32 %v1463_v29, %v1462_v46 }
 0x168   : > { %v1535_v0 = vmul.f32 %v1749_v42, %v1403_v44  ;;  %v1565_v1 = vadd.f32 %v1564_v34, %v1563_v47  ;;  %v766_v2 = vsel %vm762_vm7, %v734_v48, 0.0  ;;  %v742_v3 = vmul.f32 %v711_v54, %v619_v51  ;;  %v1404_v42 = vld [vmem:[#allocation2 + $0x2e8] sm:$0xff] }
 0x169   : > { %v844_v4 = vmul.f32 %v1757_v53, %v711_v54  ;;  %v867_v7 = vsel %vm762_vm7, %v836_v49, 0.0  ;;  %v999_v8 = vsel %vm762_vm7, %v968_v50, 0.0  ;;  %v976_v9 = vmul.f32 %v945_v60, %v619_v51 }
 0x16a   : > { %v1077_v10 = vmul.f32 %v1757_v53, %v945_v60  ;;  %v1100_v11 = vsel %vm762_vm7, %v1069_v56, 0.0  ;;  %v1232_v12 = vsel %vm762_vm7, %v1201_v57, 0.0  ;;  %v1333_v13 = vsel %vm762_vm7, %v1302_v58, 0.0 }
 0x16b   : > { %v1465_v14 = vsel %vm762_vm7, %v1434_v59, 0.0  ;;  %v767_v15 = vadd.f32 %v766_v2, %v765_v35  ;;  %v1566_v16 = vsel %vm762_vm7, %v1535_v0, 0.0  ;;  %v1209_v17 = vmul.f32 %v1178_v5, %v619_v51 }
 0x16c   : > { %v1310_v18 = vmul.f32 %v1757_v53, %v1178_v5  ;;  %v868_v19 = vadd.f32 %v867_v7, %v866_v36  ;;  %v1000_v20 = vadd.f32 %v999_v8, %v998_v37  ;;  %vm522_vm12 = vcmp.ne.f32.partialorder %v438_v55, %v438_v55  ;;  %v946_v5 = vld [vmem:[#allocation2 + $0x148] sm:$0xff] }
 0x16d   : > { %v582_v22 = vand.u32 2147483647, %v438_v55  ;;  %v1101_v24 = vadd.f32 %v1100_v11, %v1099_v39  ;;  %v1233_v25 = vadd.f32 %v1232_v12, %v1231_v61  ;;  %v1334_v26 = vadd.f32 %v1333_v13, %v1332_v62  ;;  %vm552_vm13 = vmxor %vm522_vm12, %vm1887_vm3  ;;  %v2135_v50 = vpop.f32.mrf.mxu2  ;;  %v713_v62 = vld [vmem:[#allocation2 + $0x60] sm:$0xff] }
 0x16e   : > { %v2108_v27 = vadd.f32 %v1465_v14, %v1464_v63  ;;  %v2111_v29 = vadd.f32 %v1566_v16, %v1565_v1  ;;  %v2114_v30 = vsel %vm762_vm7, %v742_v3, 0.0  ;;  %v1750_v32 = vsel %vm552_vm13, 1.0, %v3077_v52  ;;  %v441_v38 = vpop.f32.mrf.mxu1  ;;  %v939_v16 = vld [vmem:[#allocation2 + $0x110] sm:$0xff] }
 0x16f   : > { %v612_v31 = vsel %vm552_vm13, %v582_v22, 0.0  ;;  %v2118_v34 = vsel %vm762_vm7, %v844_v4, 0.0  ;;  %v2121_v35 = vsel %vm762_vm7, %v976_v9, 0.0  ;;  %v1442_v36 = vmul.f32 %v1411_v21, %v619_v51  ;;  %v712_v4 = vld [vmem:[#allocation2 + $0x58] sm:$0xff]  ;;  %v1172_v22 = vld [vmem:[#allocation2 + $0x200] sm:$0xff] }
 0x170   : > { %v735_v37 = vmul.f32 %v704_v23, %v612_v31  ;;  %v837_v39 = vmul.f32 %v1750_v32, %v704_v23  ;;  %v969_v40 = vmul.f32 %v938_v28, %v612_v31  ;;  %v1070_v41 = vmul.f32 %v1750_v32, %v938_v28 }
 0x171   : > { %vm530_vm14 = vcmp.ne.f32.partialorder %v2099_v6, %v2099_v6  ;;  %v2126_v43 = vsel %vm762_vm7, %v1077_v10, 0.0  ;;  %v2129_v44 = vsel %vm762_vm7, %v1209_v17, 0.0  ;;  %v1543_v45 = vmul.f32 %v1757_v53, %v1411_v21  ;;  %v1179_v10 = vld [vmem:[#allocation2 + $0x238] sm:$0xff]  ;;  %v1412_v21 = vld [vmem:[#allocation2 + $0x328] sm:$0xff] }
 0x172   : > { %v1202_v46 = vmul.f32 %v1171_v33, %v612_v31  ;;  %v2132_v47 = vsel %vm762_vm7, %v1310_v18, 0.0  ;;  %v1303_v48 = vmul.f32 %v1750_v32, %v1171_v33  ;;  %v590_v49 = vand.u32 2147483647, %v2099_v6  ;;  %vm560_vm0 = vmxor %vm530_vm14, %vm1887_vm3 }
 0x173   : > { %vm523_vm15 = vcmp.ne.f32.partialorder %v441_v38, %v441_v38  ;;  %v2138_v51 = vsel %vm762_vm7, %v1442_v36, 0.0  ;;  %v768_v54 = vsel %vm762_vm7, %v735_v37, 0.0  ;;  %v1435_v55 = vmul.f32 %v1404_v42, %v612_v31  ;;  %v1405_v37 = vld [vmem:[#allocation2 + $0x2f0] sm:$0xff] }
 0x174   : > { %v583_v56 = vand.u32 2147483647, %v441_v38  ;;  %v869_v53 = vsel %vm762_vm7, %v837_v39, 0.0  ;;  %v1001_v57 = vsel %vm762_vm7, %v969_v40, 0.0  ;;  %v1102_v58 = vsel %vm762_vm7, %v1070_v41, 0.0  ;;  %vm2150_vm1 = vmxor %vm523_vm15, %vm1887_vm3 }
 0x175   : > { %v1536_v59 = vmul.f32 %v1750_v32, %v1404_v42  ;;  %v2146_v60 = vsel %vm762_vm7, %v1543_v45, 0.0  ;;  %v1234_v61 = vsel %vm762_vm7, %v1202_v46, 0.0  ;;  %vm531_vm2 = vcmp.ne.f32.partialorder %v2135_v50, %v2135_v50 }
 0x176   : > { %v591_v63 = vand.u32 2147483647, %v2135_v50  ;;  %v769_v0 = vadd.f32 %v768_v54, %v767_v15  ;;  %v1335_v1 = vsel %vm762_vm7, %v1303_v48, 0.0  ;;  %v620_v2 = vsel %vm560_vm0, %v590_v49, 0.0  ;;  %v705_v15 = vld [vmem:[#allocation2 + $0x20] sm:$0xff]  ;;  %v444_v46 = vpop.f32.mrf.mxu1  ;;  %vm561_vm4 = vmxor %vm531_vm2, %vm1887_vm3 }
 0x177   : > { %v1758_v3 = vsel %vm560_vm0, 1.0, %v3077_v52  ;;  %v870_v6 = vadd.f32 %v869_v53, %v868_v19  ;;  %v1002_v7 = vadd.f32 %v1001_v57, %v1000_v20  ;;  %v1103_v8 = vadd.f32 %v1102_v58, %v1101_v24 }
 0x178   : > { %v1467_v9 = vsel %vm762_vm7, %v1435_v55, 0.0  ;;  %v1235_v11 = vadd.f32 %v1234_v61, %v1233_v25  ;;  %v1568_v12 = vsel %vm762_vm7, %v1536_v59, 0.0  ;;  %v613_v13 = vsel %vm2150_vm1, %v583_v56, 0.0 }
 0x179   : > { %v1751_v14 = vsel %vm2150_vm1, 1.0, %v3077_v52  ;;  %v1336_v17 = vadd.f32 %v1335_v1, %v1334_v26  ;;  %v743_v18 = vmul.f32 %v712_v4, %v620_v2  ;;  %v845_v19 = vmul.f32 %v1758_v3, %v712_v4 }
 0x17a   : > { %v977_v20 = vmul.f32 %v946_v5, %v620_v2  ;;  %v1468_v23 = vadd.f32 %v1467_v9, %v2108_v27  ;;  %v1078_v24 = vmul.f32 %v1758_v3, %v946_v5  ;;  %v1210_v25 = vmul.f32 %v1179_v10, %v620_v2 }
 0x17b   : > { %v1311_v28 = vmul.f32 %v1758_v3, %v1179_v10  ;;  %v1569_v31 = vadd.f32 %v1568_v12, %v2111_v29  ;;  %v736_v32 = vmul.f32 %v705_v15, %v613_v13  ;;  %v838_v33 = vmul.f32 %v1751_v14, %v705_v15 }
 0x17c   : > { %v970_v36 = vmul.f32 %v939_v16, %v613_v13  ;;  %v1443_v38 = vmul.f32 %v1412_v21, %v620_v2  ;;  %v1544_v39 = vmul.f32 %v1758_v3, %v1412_v21  ;;  %v1071_v40 = vmul.f32 %v1751_v14, %v939_v16  ;;  %v947_v3 = vld [vmem:[#allocation2 + $0x150] sm:$0xff] }
 0x17d   : > { %v1203_v26 = vmul.f32 %v1172_v22, %v613_v13  ;;  %v2169_v41 = vsel %vm762_vm7, %v743_v18, 0.0  ;;  %v2172_v42 = vsel %vm762_vm7, %v845_v19, 0.0  ;;  %v2175_v27 = vsel %vm762_vm7, %v977_v20, 0.0  ;;  %v706_v19 = vld [vmem:[#allocation2 + $0x28] sm:$0xff]  ;;  %v489_v20 = vpop.f32.mrf.mxu3 }
 0x17e   : > { %v1304_v45 = vmul.f32 %v1751_v14, %v1172_v22  ;;  %v2178_v29 = vsel %vm762_vm7, %v1078_v24, 0.0  ;;  %v2181_v48 = vsel %vm762_vm7, %v1210_v25, 0.0  ;;  %v2184_v49 = vsel %vm762_vm7, %v1311_v28, 0.0  ;;  %v1413_v22 = vld [vmem:[#allocation2 + $0x330] sm:$0xff]  ;;  %v940_v24 = vld [vmem:[#allocation2 + $0x118] sm:$0xff] }
 0x17f   : > { %v1436_v54 = vmul.f32 %v1405_v37, %v613_v13  ;;  %v770_v55 = vsel %vm762_vm7, %v736_v32, 0.0  ;;  %v871_v56 = vsel %vm762_vm7, %v838_v33, 0.0  ;;  %v1003_v53 = vsel %vm762_vm7, %v970_v36, 0.0  ;;  %v1180_v13 = vld [vmem:[#allocation2 + $0x240] sm:$0xff] }
 0x180   : > { %v1537_v57 = vmul.f32 %v1751_v14, %v1405_v37  ;;  %v2194_v58 = vsel %vm762_vm7, %v1443_v38, 0.0  ;;  %v1104_v59 = vsel %vm762_vm7, %v1071_v40, 0.0  ;;  %v1236_v61 = vsel %vm762_vm7, %v1203_v26, 0.0  ;;  %v1173_v40 = vld [vmem:[#allocation2 + $0x208] sm:$0xff] }
 0x181   : > { %vm524_vm5 = vcmp.ne.f32.partialorder %v444_v46, %v444_v46  ;;  %v1337_v1 = vsel %vm762_vm7, %v1304_v45, 0.0  ;;  %v621_v50 = vsel %vm561_vm4, %v591_v63, 0.0  ;;  %v1759_v2 = vsel %vm561_vm4, 1.0, %v3077_v52 }
 0x182   : > { %v584_v4 = vand.u32 2147483647, %v444_v46  ;;  %v2201_v5 = vsel %vm762_vm7, %v1544_v39, 0.0  ;;  %v771_v9 = vadd.f32 %v770_v55, %v769_v0  ;;  %v872_v10 = vadd.f32 %v871_v56, %v870_v6  ;;  %vm2204_vm6 = vmxor %vm524_vm5, %vm1887_vm3 }
 0x183   : > { %v1004_v12 = vadd.f32 %v1003_v53, %v1002_v7  ;;  %v1105_v15 = vadd.f32 %v1104_v59, %v1103_v8  ;;  %v2208_v16 = vadd.f32 %v1236_v61, %v1235_v11  ;;  %v1469_v63 = vsel %vm762_vm7, %v1436_v54, 0.0  ;;  %v1406_v54 = vld [vmem:[#allocation2 + $0x2f8] sm:$0xff]  ;;  %v468_v59 = vpop.f32.mrf.mxu2 }
 0x184   : > { %v1570_v18 = vsel %vm762_vm7, %v1537_v57, 0.0  ;;  %v2212_v21 = vadd.f32 %v1337_v1, %v1336_v17  ;;  %v744_v0 = vmul.f32 %v713_v62, %v621_v50  ;;  %v846_v6 = vmul.f32 %v1759_v2, %v713_v62 }
 0x185   : > { %v978_v7 = vmul.f32 %v947_v3, %v621_v50  ;;  %v1079_v25 = vmul.f32 %v1759_v2, %v947_v3  ;;  %v1211_v28 = vmul.f32 %v1180_v13, %v621_v50  ;;  %v614_v8 = vsel %vm2204_vm6, %v584_v4, 0.0 }
 0x186   : > { %v1752_v11 = vsel %vm2204_vm6, 1.0, %v3077_v52  ;;  %v1470_v32 = vadd.f32 %v1469_v63, %v1468_v23  ;;  %v737_v33 = vmul.f32 %v706_v19, %v614_v8  ;;  %vm539_vm8 = vcmp.ne.f32.partialorder %v489_v20, %v489_v20 }
 0x187   : > { %v839_v36 = vmul.f32 %v1752_v11, %v706_v19  ;;  %v1571_v17 = vadd.f32 %v1570_v18, %v1569_v31  ;;  %v1312_v37 = vmul.f32 %v1759_v2, %v1180_v13  ;;  %v1444_v38 = vmul.f32 %v1413_v22, %v621_v50  ;;  %vm2236_vm9 = vmxor %vm539_vm8, %vm1887_vm3  ;;  %v721_v19 = vld [vmem:[#allocation2 + $0xa0] sm:$0xff] }
 0x188   : > { %v971_v39 = vmul.f32 %v940_v24, %v614_v8  ;;  %v2220_v26 = vsel %vm762_vm7, %v744_v0, 0.0  ;;  %v1545_v45 = vmul.f32 %v1759_v2, %v1413_v22  ;;  %v1072_v46 = vmul.f32 %v1752_v11, %v940_v24  ;;  %v955_v22 = vld [vmem:[#allocation2 + $0x190] sm:$0xff]  ;;  %v1188_v24 = vld [vmem:[#allocation2 + $0x280] sm:$0xff] }
 0x189   : > { %v599_v55 = vand.u32 2147483647, %v489_v20  ;;  %v2223_v56 = vsel %vm762_vm7, %v846_v6, 0.0  ;;  %v2226_v23 = vsel %vm762_vm7, %v978_v7, 0.0  ;;  %v2229_v53 = vsel %vm762_vm7, %v1079_v25, 0.0 }
 0x18a   : > { %v2232_v31 = vsel %vm762_vm7, %v1211_v28, 0.0  ;;  %v772_v61 = vsel %vm762_vm7, %v737_v33, 0.0  ;;  %v873_v62 = vsel %vm762_vm7, %v839_v36, 0.0  ;;  %v1204_v1 = vmul.f32 %v1173_v40, %v614_v8  ;;  %v447_v33 = vpop.f32.mrf.mxu1 }
 0x18b   : > { %v1305_v50 = vmul.f32 %v1752_v11, %v1173_v40  ;;  %v2243_v2 = vsel %vm762_vm7, %v1312_v37, 0.0  ;;  %v1005_v3 = vsel %vm762_vm7, %v971_v39, 0.0  ;;  %v1437_v4 = vmul.f32 %v1406_v54, %v614_v8 }
 0x18c   : > { %v1538_v13 = vmul.f32 %v1752_v11, %v1406_v54  ;;  %v2247_v14 = vsel %vm762_vm7, %v1444_v38, 0.0  ;;  %v1106_v63 = vsel %vm762_vm7, %v1072_v46, 0.0  ;;  %v629_v18 = vsel %vm2236_vm9, %v599_v55, 0.0 }
 0x18d   : > { %vm532_vm10 = vcmp.ne.f32.partialorder %v468_v59, %v468_v59  ;;  %v2253_v20 = vsel %vm762_vm7, %v1545_v45, 0.0  ;;  %v2255_v0 = vadd.f32 %v772_v61, %v771_v9  ;;  %v2257_v6 = vadd.f32 %v873_v62, %v872_v10  ;;  %v1421_v45 = vld [vmem:[#allocation2 + $0x370] sm:$0xff]  ;;  %v948_v62 = vld [vmem:[#allocation2 + $0x158] sm:$0xff] }
 0x18e   : > { %3088 = vst [vmem:[#allocation5_spill] sm:$0xff] %v2253_v20  ;;  %v1767_v7 = vsel %vm2236_vm9, 1.0, %v3077_v52  ;;  %v2262_v25 = vadd.f32 %v1005_v3, %v1004_v12  ;;  %v1238_v28 = vsel %vm762_vm7, %v1204_v1, 0.0  ;;  %v1339_v8 = vsel %vm762_vm7, %v1305_v50, 0.0  ;;  %vm562_vm11 = vmxor %vm532_vm10, %vm1887_vm3 }
 0x18f   : > { %v592_v11 = vand.u32 2147483647, %v468_v59  ;;  %v2266_v36 = vadd.f32 %v1106_v63, %v1105_v15  ;;  %v1471_v9 = vsel %vm762_vm7, %v1437_v4, 0.0  ;;  %v1572_v10 = vsel %vm762_vm7, %v1538_v13, 0.0  ;;  %v714_v59 = vld [vmem:[#allocation2 + $0x68] sm:$0xff] }
 0x190   : > { %v752_v37 = vmul.f32 %v721_v19, %v629_v18  ;;  %v854_v38 = vmul.f32 %v1767_v7, %v721_v19  ;;  %v986_v39 = vmul.f32 %v955_v22, %v629_v18  ;;  %v1087_v12 = vmul.f32 %v1767_v7, %v955_v22  ;;  %v1181_v13 = vld [vmem:[#allocation2 + $0x248] sm:$0xff] }
 0x191   : > { %v1219_v40 = vmul.f32 %v1188_v24, %v629_v18  ;;  %v2273_v46 = vadd.f32 %v1238_v28, %v2208_v16  ;;  %v2276_v54 = vadd.f32 %v1339_v8, %v2212_v21  ;;  %v1320_v15 = vmul.f32 %v1767_v7, %v1188_v24  ;;  %v1407_v21 = vld [vmem:[#allocation2 + $0x300] sm:$0xff] }
 0x192   : > { %vm525_vm12 = vcmp.ne.f32.partialorder %v447_v33, %v447_v33  ;;  %v2278_v55 = vadd.f32 %v1471_v9, %v1470_v32  ;;  %v622_v57 = vsel %vm562_vm11, %v592_v11, 0.0  ;;  %v1760_v61 = vsel %vm562_vm11, 1.0, %v3077_v52  ;;  %v1414_v11 = vld [vmem:[#allocation2 + $0x338] sm:$0xff] }
 0x193   : > { %v585_v1 = vand.u32 2147483647, %v447_v33  ;;  %v2281_v50 = vadd.f32 %v1572_v10, %v1571_v17  ;;  %v2284_v3 = vsel %vm762_vm7, %v752_v37, 0.0  ;;  %v1452_v16 = vmul.f32 %v1421_v45, %v629_v18  ;;  %vm2287_vm13 = vmxor %vm525_vm12, %vm1887_vm3  ;;  %v707_v18 = vld [vmem:[#allocation2 + $0x30] sm:$0xff]  ;;  %v941_v33 = vld [vmem:[#allocation2 + $0x120] sm:$0xff] }
 0x194   : > { %3089 = vst [vmem:[#allocation6_spill] sm:$0xff] %v2284_v3  ;;  %v1553_v4 = vmul.f32 %v1767_v7, %v1421_v45  ;;  %v2292_v32 = vsel %vm762_vm7, %v854_v38, 0.0  ;;  %v2295_v63 = vsel %vm762_vm7, %v986_v39, 0.0  ;;  %v2298_v17 = vsel %vm762_vm7, %v1087_v12, 0.0  ;;  %v492_v7 = vpop.f32.mrf.mxu3 }
 0x195   : > { %3092 = vst [vmem:[#allocation7_spill] sm:$0xff] %v2292_v32  ;;  %v2301_v19 = vsel %vm762_vm7, %v1219_v40, 0.0  ;;  %v2304_v22 = vsel %vm762_vm7, %v1320_v15, 0.0  ;;  %v745_v24 = vmul.f32 %v714_v59, %v622_v57  ;;  %v847_v28 = vmul.f32 %v1760_v61, %v714_v59 }
 0x196   : > { %3093 = vst [vmem:[#allocation8_spill] sm:$0xff] %v2295_v63  ;;  %v979_v8 = vmul.f32 %v948_v62, %v622_v57  ;;  %v1080_v9 = vmul.f32 %v1760_v61, %v948_v62  ;;  %v1212_v10 = vmul.f32 %v1181_v13, %v622_v57  ;;  %v615_v37 = vsel %vm2287_vm13, %v585_v1, 0.0  ;;  %v450_v63 = vpop.f32.mrf.mxu1 }
 0x197   : > { %3094 = vst [vmem:[#allocation9_spill] sm:$0xff] %v2298_v17  ;;  %v1753_v38 = vsel %vm2287_vm13, 1.0, %v3077_v52  ;;  %v2312_v39 = vsel %vm762_vm7, %v1452_v16, 0.0  ;;  %v738_v12 = vmul.f32 %v707_v18, %v615_v37  ;;  %vm540_vm14 = vcmp.ne.f32.partialorder %v492_v7, %v492_v7 }
 0x198   : > { %3095 = vst [vmem:[#allocation10_spill] sm:$0xff] %v2301_v19  ;;  %v840_v40 = vmul.f32 %v1753_v38, %v707_v18  ;;  %v2315_v45 = vsel %vm762_vm7, %v1553_v4, 0.0  ;;  %v1313_v15 = vmul.f32 %v1760_v61, %v1181_v13  ;;  %v1445_v59 = vmul.f32 %v1414_v11, %v622_v57  ;;  %vm2334_vm15 = vmxor %vm540_vm14, %vm1887_vm3 }
 0x199   : > { %3096 = vst [vmem:[#allocation11_spill] sm:$0xff] %v2304_v22  ;;  %v972_v62 = vmul.f32 %v941_v33, %v615_v37  ;;  %v1174_v22 = vld [vmem:[#allocation2 + $0x210] sm:$0xff]  ;;  %v2318_v17 = vsel %vm762_vm7, %v745_v24, 0.0  ;;  %v1546_v1 = vmul.f32 %v1760_v61, %v1414_v11  ;;  %v1073_v32 = vmul.f32 %v1753_v38, %v941_v33  ;;  %v471_v61 = vpop.f32.mrf.mxu2 }
 0x19a   : > { %3097 = vst [vmem:[#allocation12_spill] sm:$0xff] %v2312_v39  ;;  %v600_v52 = vand.u32 2147483647, %v492_v7  ;;  %v2321_v16 = vsel %vm762_vm7, %v847_v28, 0.0  ;;  %v2324_v18 = vsel %vm762_vm7, %v979_v8, 0.0  ;;  %v2327_v4 = vsel %vm762_vm7, %v1080_v9, 0.0 }
 0x19b   : > { %3098 = vst [vmem:[#allocation13_spill] sm:$0xff] %v2315_v45  ;;  %v2330_v57 = vsel %vm762_vm7, %v1212_v10, 0.0  ;;  %v774_v24 = vsel %vm762_vm7, %v738_v12, 0.0  ;;  %v875_v28 = vsel %vm762_vm7, %v840_v40, 0.0  ;;  %v1205_v11 = vmul.f32 %v1174_v22, %v615_v37  ;;  %v722_v12 = vld [vmem:[#allocation2 + $0xa8] sm:$0xff] }
 0x19c   : > { %3099 = vst [vmem:[#allocation14_spill] sm:$0xff] %v2327_v4  ;;  %v1306_v8 = vmul.f32 %v1753_v38, %v1174_v22  ;;  %v2341_v33 = vsel %vm762_vm7, %v1313_v15, 0.0  ;;  %v1007_v9 = vsel %vm762_vm7, %v972_v62, 0.0  ;;  %v1438_v10 = vmul.f32 %v1407_v21, %v615_v37 }
 0x19d   : > { %3100 = vst [vmem:[#allocation15_spill] sm:$0xff] %v2330_v57  ;;  %v1539_v45 = vmul.f32 %v1753_v38, %v1407_v21  ;;  %v2345_v7 = vsel %vm762_vm7, %v1445_v59, 0.0  ;;  %v1108_v39 = vsel %vm762_vm7, %v1073_v32, 0.0  ;;  %v630_v19 = vsel %vm2334_vm15, %v600_v52, 0.0  ;;  %v956_v59 = vld [vmem:[#allocation2 + $0x198] sm:$0xff]  ;;  %v1189_v32 = vld [vmem:[#allocation2 + $0x288] sm:$0xff] }
 0x19e   : > { %3103 = vst [vmem:[#allocation16_spill] sm:$0xff] %v2341_v33  ;;  %vm533_vm0 = vcmp.ne.f32.partialorder %v471_v61, %v471_v61  ;;  %v2351_v40 = vsel %vm762_vm7, %v1546_v1, 0.0  ;;  %v2354_v22 = vadd.f32 %v774_v24, %v2255_v0  ;;  %v2357_v15 = vadd.f32 %v875_v28, %v2257_v6 }
 0x19f   : > { %3104 = vst [vmem:[#allocation17_spill] sm:$0xff] %v2345_v7  ;;  %v3106_v37 = vmov 0.0   ;;  %v2363_v62 = vadd.f32 %v1007_v9, %v2262_v25  ;;  %v1240_v52 = vsel %vm762_vm7, %v1205_v11, 0.0  ;;  %v1341_v1 = vsel %vm762_vm7, %v1306_v8, 0.0  ;;  %vm563_vm1 = vmxor %vm533_vm0, %vm1887_vm3  ;;  %v1422_v11 = vld [vmem:[#allocation2 + $0x378] sm:$0xff] }
 0x1a0   : > { %3105 = vst [vmem:[#allocation18_spill] sm:$0xff] %v2351_v40  ;;  %v1768_v38 = vsel %vm2334_vm15, 1.0, %v3106_v37  ;;  %v593_v21 = vand.u32 2147483647, %v471_v61  ;;  %v2368_v0 = vadd.f32 %v1108_v39, %v2266_v36  ;;  %v1473_v6 = vsel %vm762_vm7, %v1438_v10, 0.0  ;;  %v715_v10 = vld [vmem:[#allocation2 + $0x70] sm:$0xff] }
 0x1a1   : > { %v1574_v24 = vsel %vm762_vm7, %v1539_v45, 0.0  ;;  %v753_v13 = vmul.f32 %v722_v12, %v630_v19  ;;  %v855_v28 = vmul.f32 %v1768_v38, %v722_v12  ;;  %v987_v25 = vmul.f32 %v956_v59, %v630_v19  ;;  %v949_v12 = vld [vmem:[#allocation2 + $0x160] sm:$0xff] }
 0x1a2   : > { %v1088_v9 = vmul.f32 %v1768_v38, %v956_v59  ;;  %v1220_v3 = vmul.f32 %v1189_v32, %v630_v19  ;;  %v2375_v8 = vadd.f32 %v1240_v52, %v2273_v46  ;;  %v2378_v40 = vadd.f32 %v1341_v1, %v2276_v54  ;;  %v1182_v1 = vld [vmem:[#allocation2 + $0x250] sm:$0xff] }
 0x1a3   : > { %v1321_v36 = vmul.f32 %v1768_v38, %v1189_v32  ;;  %vm526_vm2 = vcmp.ne.f32.partialorder %v450_v63, %v450_v63  ;;  %v2381_v39 = vadd.f32 %v1473_v6, %v2278_v55  ;;  %v623_v45 = vsel %vm563_vm1, %v593_v21, 0.0  ;;  %v1408_v32 = vld [vmem:[#allocation2 + $0x308] sm:$0xff] }
 0x1a4   : > { %v1761_v61 = vsel %vm563_vm1, 1.0, %v3106_v37  ;;  %v586_v7 = vand.u32 2147483647, %v450_v63  ;;  %v2385_v59 = vadd.f32 %v1574_v24, %v2281_v50  ;;  %v2388_v46 = vsel %vm762_vm7, %v753_v13, 0.0  ;;  %vm2391_vm4 = vmxor %vm526_vm2, %vm1887_vm3 }
 0x1a5   : > { %3107 = vst [vmem:[#allocation19_spill] sm:$0xff] %v2388_v46  ;;  %v1453_v52 = vmul.f32 %v1422_v11, %v630_v19  ;;  %v1554_v54 = vmul.f32 %v1768_v38, %v1422_v11  ;;  %v2396_v55 = vsel %vm762_vm7, %v855_v28, 0.0  ;;  %v2399_v21 = vsel %vm762_vm7, %v987_v25, 0.0  ;;  %v708_v19 = vld [vmem:[#allocation2 + $0x38] sm:$0xff]  ;;  %v495_v38 = vpop.f32.mrf.mxu3  ;;  %v1415_v46 = vld [vmem:[#allocation2 + $0x340] sm:$0xff]  ;;  %v942_v28 = vld [vmem:[#allocation2 + $0x128] sm:$0xff] }
 0x1a6   : > { %3110 = vst [vmem:[#allocation20_spill] sm:$0xff] %v2396_v55  ;;  %v2402_v50 = vsel %vm762_vm7, %v1088_v9, 0.0  ;;  %v2405_v63 = vsel %vm762_vm7, %v1220_v3, 0.0  ;;  %v2408_v6 = vsel %vm762_vm7, %v1321_v36, 0.0  ;;  %v746_v24 = vmul.f32 %v715_v10, %v623_v45 }
 0x1a7   : > { %3111 = vst [vmem:[#allocation21_spill] sm:$0xff] %v2399_v21  ;;  %v848_v13 = vmul.f32 %v1761_v61, %v715_v10  ;;  %v980_v11 = vmul.f32 %v949_v12, %v623_v45  ;;  %v1081_v55 = vmul.f32 %v1761_v61, %v949_v12  ;;  %v1213_v33 = vmul.f32 %v1182_v1, %v623_v45 }
 0x1a8   : > { %3112 = vst [vmem:[#allocation22_spill] sm:$0xff] %v2402_v50  ;;  %v616_v25 = vsel %vm2391_vm4, %v586_v7, 0.0  ;;  %v1754_v3 = vsel %vm2391_vm4, 1.0, %v3106_v37  ;;  %v2416_v9 = vsel %vm762_vm7, %v1453_v52, 0.0  ;;  %vm541_vm5 = vcmp.ne.f32.partialorder %v495_v38, %v495_v38 }
 0x1a9   : > { %3113 = vst [vmem:[#allocation23_spill] sm:$0xff] %v2405_v63  ;;  %v739_v50 = vmul.f32 %v708_v19, %v616_v25  ;;  %v841_v36 = vmul.f32 %v1754_v3, %v708_v19  ;;  %v2419_v10 = vsel %vm762_vm7, %v1554_v54, 0.0  ;;  %v1446_v21 = vmul.f32 %v1415_v46, %v623_v45  ;;  %v1175_v63 = vld [vmem:[#allocation2 + $0x218] sm:$0xff]  ;;  %vm2438_vm6 = vmxor %vm541_vm5, %vm1887_vm3 }
 0x1aa   : > { %3114 = vst [vmem:[#allocation24_spill] sm:$0xff] %v2408_v6  ;;  %v1314_v6 = vmul.f32 %v1761_v61, %v1182_v1  ;;  %v973_v12 = vmul.f32 %v942_v28, %v616_v25  ;;  %v2422_v20 = vsel %vm762_vm7, %v746_v24, 0.0  ;;  %v1547_v7 = vmul.f32 %v1761_v61, %v1415_v46  ;;  %v474_v61 = vpop.f32.mrf.mxu2 }
 0x1ab   : > { %3115 = vst [vmem:[#allocation25_spill] sm:$0xff] %v2416_v9  ;;  %v1074_v57 = vmul.f32 %v1754_v3, %v942_v28  ;;  %v601_v4 = vand.u32 2147483647, %v495_v38  ;;  %v2425_v52 = vsel %vm762_vm7, %v848_v13, 0.0  ;;  %v2428_v19 = vsel %vm762_vm7, %v980_v11, 0.0 }
 0x1ac   : > { %3116 = vst [vmem:[#allocation26_spill] sm:$0xff] %v2419_v10  ;;  %v2431_v54 = vsel %vm762_vm7, %v1081_v55, 0.0  ;;  %v2434_v45 = vsel %vm762_vm7, %v1213_v33, 0.0  ;;  %v776_v46 = vsel %vm762_vm7, %v739_v50, 0.0  ;;  %v877_v24 = vsel %vm762_vm7, %v841_v36, 0.0  ;;  %v723_v50 = vld [vmem:[#allocation2 + $0xb0] sm:$0xff] }
 0x1ad   : > { %3117 = vst [vmem:[#allocation27_spill] sm:$0xff] %v2422_v20  ;;  %v1206_v13 = vmul.f32 %v1175_v63, %v616_v25  ;;  %v1307_v11 = vmul.f32 %v1754_v3, %v1175_v63  ;;  %v2445_v28 = vsel %vm762_vm7, %v1314_v6, 0.0  ;;  %v1009_v55 = vsel %vm762_vm7, %v973_v12, 0.0 }
 0x1ae   : > { %3118 = vst [vmem:[#allocation28_spill] sm:$0xff] %v2425_v52  ;;  %v1439_v33 = vmul.f32 %v1408_v32, %v616_v25  ;;  %v1540_v10 = vmul.f32 %v1754_v3, %v1408_v32  ;;  %v2449_v38 = vsel %vm762_vm7, %v1446_v21, 0.0  ;;  %v1110_v9 = vsel %vm762_vm7, %v1074_v57, 0.0  ;;  %v957_v25 = vld [vmem:[#allocation2 + $0x1a0] sm:$0xff]  ;;  %v1190_v57 = vld [vmem:[#allocation2 + $0x290] sm:$0xff]  ;;  %v453_v32 = vpop.f32.mrf.mxu1 }
 0x1af   : > { %3119 = vst [vmem:[#allocation29_spill] sm:$0xff] %v2428_v19  ;;  %vm534_vm8 = vcmp.ne.f32.partialorder %v474_v61, %v474_v61  ;;  %v2455_v36 = vsel %vm762_vm7, %v1547_v7, 0.0  ;;  %v2458_v63 = vadd.f32 %v776_v46, %v2354_v22  ;;  %v2461_v6 = vadd.f32 %v877_v24, %v2357_v15 }
 0x1b0   : > { %3120 = vst [vmem:[#allocation30_spill] sm:$0xff] %v2431_v54  ;;  %v1769_v21 = vsel %vm2438_vm6, 1.0, %v3106_v37  ;;  %v2467_v3 = vadd.f32 %v1009_v55, %v2363_v62  ;;  %v1343_v12 = vsel %vm762_vm7, %v1307_v11, 0.0  ;;  %v594_v7 = vand.u32 2147483647, %v474_v61  ;;  %vm564_vm9 = vmxor %vm534_vm8, %vm1887_vm3  ;;  %v1416_v54 = vld [vmem:[#allocation2 + $0x348] sm:$0xff] }
 0x1b1   : > { %3121 = vst [vmem:[#allocation31_spill] sm:$0xff] %v2434_v45  ;;  %v631_v45 = vsel %vm2438_vm6, %v601_v4, 0.0  ;;  %v1242_v4 = vsel %vm762_vm7, %v1206_v13, 0.0  ;;  %v2472_v22 = vadd.f32 %v1110_v9, %v2368_v0  ;;  %v1475_v15 = vsel %vm762_vm7, %v1439_v33, 0.0  ;;  %v1423_v13 = vld [vmem:[#allocation2 + $0x380] sm:$0xff]  ;;  %v716_v33 = vld [vmem:[#allocation2 + $0x78] sm:$0xff] }
 0x1b2   : > { %3124 = vst [vmem:[#allocation32_spill] sm:$0xff] %v2445_v28  ;;  %v1576_v46 = vsel %vm762_vm7, %v1540_v10, 0.0  ;;  %v754_v1 = vmul.f32 %v723_v50, %v631_v45  ;;  %v856_v24 = vmul.f32 %v1769_v21, %v723_v50  ;;  %v988_v62 = vmul.f32 %v957_v25, %v631_v45  ;;  %v950_v50 = vld [vmem:[#allocation2 + $0x168] sm:$0xff] }
 0x1b3   : > { %3125 = vst [vmem:[#allocation33_spill] sm:$0xff] %v2449_v38  ;;  %v1089_v55 = vmul.f32 %v1769_v21, %v957_v25  ;;  %v2479_v11 = vadd.f32 %v1242_v4, %v2375_v8  ;;  %v2482_v38 = vadd.f32 %v1343_v12, %v2378_v40  ;;  %v1322_v0 = vmul.f32 %v1769_v21, %v1190_v57  ;;  %v1183_v12 = vld [vmem:[#allocation2 + $0x258] sm:$0xff] }
 0x1b4   : > { %3126 = vst [vmem:[#allocation34_spill] sm:$0xff] %v2455_v36  ;;  %v1221_v36 = vmul.f32 %v1190_v57, %v631_v45  ;;  %vm527_vm10 = vcmp.ne.f32.partialorder %v453_v32, %v453_v32  ;;  %v2485_v9 = vadd.f32 %v1475_v15, %v2381_v39  ;;  %v624_v10 = vsel %vm564_vm9, %v594_v7, 0.0  ;;  %v1409_v57 = vld [vmem:[#allocation2 + $0x310] sm:$0xff] }
 0x1b5   : > { %v1762_v61 = vsel %vm564_vm9, 1.0, %v3106_v37  ;;  %v587_v28 = vand.u32 2147483647, %v453_v32  ;;  %v2489_v25 = vadd.f32 %v1576_v46, %v2385_v59  ;;  %v2492_v8 = vsel %vm762_vm7, %v754_v1, 0.0  ;;  %vm2495_vm11 = vmxor %vm527_vm10, %vm1887_vm3 }
 0x1b6   : > { %3127 = vst [vmem:[#allocation35_spill] sm:$0xff] %v2492_v8  ;;  %v1454_v4 = vmul.f32 %v1423_v13, %v631_v45  ;;  %v1555_v40 = vmul.f32 %v1769_v21, %v1423_v13  ;;  %v2500_v39 = vsel %vm762_vm7, %v856_v24, 0.0  ;;  %v2503_v7 = vsel %vm762_vm7, %v988_v62, 0.0  ;;  %v709_v45 = vld [vmem:[#allocation2 + $0x40] sm:$0xff]  ;;  %v498_v21 = vpop.f32.mrf.mxu3  ;;  %v943_v8 = vld [vmem:[#allocation2 + $0x130] sm:$0xff] }
 0x1b7   : > { %3130 = vst [vmem:[#allocation36_spill] sm:$0xff] %v2500_v39  ;;  %v2506_v59 = vsel %vm762_vm7, %v1089_v55, 0.0  ;;  %v2509_v32 = vsel %vm762_vm7, %v1221_v36, 0.0  ;;  %v2512_v15 = vsel %vm762_vm7, %v1322_v0, 0.0  ;;  %v747_v46 = vmul.f32 %v716_v33, %v624_v10 }
 0x1b8   : > { %3131 = vst [vmem:[#allocation37_spill] sm:$0xff] %v2503_v7  ;;  %v849_v1 = vmul.f32 %v1762_v61, %v716_v33  ;;  %v981_v13 = vmul.f32 %v950_v50, %v624_v10  ;;  %v1082_v24 = vmul.f32 %v1762_v61, %v950_v50  ;;  %v1214_v39 = vmul.f32 %v1183_v12, %v624_v10 }
 0x1b9   : > { %3132 = vst [vmem:[#allocation38_spill] sm:$0xff] %v2506_v59  ;;  %v617_v62 = vsel %vm2495_vm11, %v587_v28, 0.0  ;;  %v1755_v36 = vsel %vm2495_vm11, 1.0, %v3106_v37  ;;  %v2520_v55 = vsel %vm762_vm7, %v1454_v4, 0.0  ;;  %vm542_vm12 = vcmp.ne.f32.partialorder %v498_v21, %v498_v21 }
 0x1ba   : > { %3133 = vst [vmem:[#allocation39_spill] sm:$0xff] %v2509_v32  ;;  %v740_v59 = vmul.f32 %v709_v45, %v617_v62  ;;  %v842_v0 = vmul.f32 %v1755_v36, %v709_v45  ;;  %v2523_v33 = vsel %vm762_vm7, %v1555_v40, 0.0  ;;  %v974_v50 = vmul.f32 %v943_v8, %v617_v62  ;;  %v1176_v32 = vld [vmem:[#allocation2 + $0x220] sm:$0xff]  ;;  %vm2542_vm13 = vmxor %vm542_vm12, %vm1887_vm3 }
 0x1bb   : > { %3134 = vst [vmem:[#allocation40_spill] sm:$0xff] %v2512_v15  ;;  %v1315_v15 = vmul.f32 %v1762_v61, %v1183_v12  ;;  %v1075_v7 = vmul.f32 %v1755_v36, %v943_v8  ;;  %v2526_v19 = vsel %vm762_vm7, %v747_v46, 0.0  ;;  %v1447_v28 = vmul.f32 %v1416_v54, %v624_v10 }
 0x1bc   : > { %3135 = vst [vmem:[#allocation41_spill] sm:$0xff] %v2520_v55  ;;  %v1548_v52 = vmul.f32 %v1762_v61, %v1416_v54  ;;  %v602_v20 = vand.u32 2147483647, %v498_v21  ;;  %v2529_v4 = vsel %vm762_vm7, %v849_v1, 0.0  ;;  %v2532_v45 = vsel %vm762_vm7, %v981_v13, 0.0  ;;  %v477_v54 = vpop.f32.mrf.mxu2 }
 0x1bd   : > { %3136 = vst [vmem:[#allocation42_spill] sm:$0xff] %v2523_v33  ;;  %v2535_v40 = vsel %vm762_vm7, %v1082_v24, 0.0  ;;  %v2538_v12 = vsel %vm762_vm7, %v1214_v39, 0.0  ;;  %v778_v10 = vsel %vm762_vm7, %v740_v59, 0.0  ;;  %v879_v61 = vsel %vm762_vm7, %v842_v0, 0.0  ;;  %v724_v59 = vld [vmem:[#allocation2 + $0xb8] sm:$0xff] }
 0x1be   : > { %3137 = vst [vmem:[#allocation43_spill] sm:$0xff] %v2529_v4  ;;  %v1207_v46 = vmul.f32 %v1176_v32, %v617_v62  ;;  %v1308_v1 = vmul.f32 %v1755_v36, %v1176_v32  ;;  %v1011_v13 = vsel %vm762_vm7, %v974_v50, 0.0  ;;  %v1112_v24 = vsel %vm762_vm7, %v1075_v7, 0.0  ;;  %v1184_v4 = vld [vmem:[#allocation2 + $0x260] sm:$0xff] }
 0x1bf   : > { %3138 = vst [vmem:[#allocation44_spill] sm:$0xff] %v2532_v45  ;;  %v1440_v55 = vmul.f32 %v1409_v57, %v617_v62  ;;  %v1541_v39 = vmul.f32 %v1755_v36, %v1409_v57  ;;  %v2551_v33 = vsel %vm762_vm7, %v1315_v15, 0.0  ;;  %v2554_v21 = vsel %vm762_vm7, %v1447_v28, 0.0  ;;  %v958_v62 = vld [vmem:[#allocation2 + $0x1a8] sm:$0xff]  ;;  %v1191_v36 = vld [vmem:[#allocation2 + $0x298] sm:$0xff] }
 0x1c0   : > { %3139 = vst [vmem:[#allocation45_spill] sm:$0xff] %v2535_v40  ;;  %vm535_vm14 = vcmp.ne.f32.partialorder %v477_v54, %v477_v54  ;;  %v2559_v0 = vsel %vm762_vm7, %v1548_v52, 0.0  ;;  %v2562_v32 = vadd.f32 %v778_v10, %v2458_v63  ;;  %v2565_v7 = vadd.f32 %v879_v61, %v2461_v6  ;;  %v1424_v52 = vld [vmem:[#allocation2 + $0x388] sm:$0xff] }
 0x1c1   : > { %3140 = vst [vmem:[#allocation46_spill] sm:$0xff] %v2538_v12  ;;  %v632_v12 = vsel %vm2542_vm13, %v602_v20, 0.0  ;;  %v1770_v15 = vsel %vm2542_vm13, 1.0, %v3106_v37  ;;  %v1012_v50 = vadd.f32 %v1011_v13, %v2467_v3  ;;  %v1113_v20 = vadd.f32 %v1112_v24, %v2472_v22  ;;  %vm2578_vm15 = vmxor %vm535_vm14, %vm1887_vm3 }
 0x1c2   : > { %3143 = vst [vmem:[#allocation47_spill] sm:$0xff] %v2551_v33  ;;  %v1244_v28 = vsel %vm762_vm7, %v1207_v46, 0.0  ;;  %v595_v57 = vand.u32 2147483647, %v477_v54  ;;  %v1345_v63 = vsel %vm762_vm7, %v1308_v1, 0.0  ;;  %v1477_v6 = vsel %vm762_vm7, %v1440_v55, 0.0 }
 0x1c3   : > { %3144 = vst [vmem:[#allocation48_spill] sm:$0xff] %v2554_v21  ;;  %v1578_v10 = vsel %vm762_vm7, %v1541_v39, 0.0  ;;  %v755_v61 = vmul.f32 %v724_v59, %v632_v12  ;;  %v857_v3 = vmul.f32 %v1770_v15, %v724_v59  ;;  %v989_v22 = vmul.f32 %v958_v62, %v632_v12  ;;  %v717_v54 = vld [vmem:[#allocation2 + $0x80] sm:$0xff] }
 0x1c4   : > { %3145 = vst [vmem:[#allocation49_spill] sm:$0xff] %v2559_v0  ;;  %v456_v0 = vpop.f32.mrf.mxu1  ;;  %v1090_v13 = vmul.f32 %v1770_v15, %v958_v62  ;;  %v1222_v46 = vmul.f32 %v1191_v36, %v632_v12  ;;  %v1323_v24 = vmul.f32 %v1770_v15, %v1191_v36  ;;  %v1455_v21 = vmul.f32 %v1424_v52, %v632_v12  ;;  %v710_v36 = vld [vmem:[#allocation2 + $0x48] sm:$0xff] }
 0x1c5   : > { %v1556_v33 = vmul.f32 %v1770_v15, %v1424_v52  ;;  %vm528_vm0 = vcmp.ne.f32.partialorder %v456_v0, %v456_v0  ;;  %v1245_v1 = vadd.f32 %v1244_v28, %v2479_v11  ;;  %v1346_v55 = vadd.f32 %v1345_v63, %v2482_v38  ;;  %v951_v11 = vld [vmem:[#allocation2 + $0x170] sm:$0xff]  ;;  %v944_v28 = vld [vmem:[#allocation2 + $0x138] sm:$0xff] }
 0x1c6   : > { %v2586_v39 = vsel %vm2578_vm15, %v595_v57, 0.0  ;;  %v588_v40 = vand.u32 2147483647, %v456_v0  ;;  %v1478_v45 = vadd.f32 %v1477_v6, %v2485_v9  ;;  %v1579_v59 = vadd.f32 %v1578_v10, %v2489_v25  ;;  %vm2599_vm1 = vmxor %vm528_vm0, %vm1887_vm3  ;;  %v1177_v10 = vld [vmem:[#allocation2 + $0x228] sm:$0xff] }
 0x1c7   : > { %v2591_v62 = vsel %vm762_vm7, %v755_v61, 0.0  ;;  %v2596_v12 = vsel %vm2578_vm15, 1.0, %v3106_v37  ;;  %v2604_v0 = vsel %vm762_vm7, %v857_v3, 0.0  ;;  %v2607_v9 = vsel %vm762_vm7, %v989_v22, 0.0  ;;  %v1410_v61 = vld [vmem:[#allocation2 + $0x318] sm:$0xff] }
 0x1c8   : > { %3148 = vst [vmem:[#allocation50_spill] sm:$0xff] %v2591_v62  ;;  %v2610_v25 = vsel %vm762_vm7, %v1090_v13, 0.0  ;;  %v2613_v15 = vsel %vm762_vm7, %v1222_v46, 0.0  ;;  %v2616_v52 = vsel %vm762_vm7, %v1323_v24, 0.0  ;;  %v2619_v57 = vsel %vm762_vm7, %v1455_v21, 0.0 }
 0x1c9   : > { %3151 = vst [vmem:[#allocation51_spill] sm:$0xff] %v2604_v0  ;;  %v2622_v63 = vsel %vm762_vm7, %v1556_v33, 0.0  ;;  %v748_v6 = vmul.f32 %v717_v54, %v2586_v39  ;;  %v850_v8 = vmul.f32 %v2596_v12, %v717_v54  ;;  %v982_v3 = vmul.f32 %v951_v11, %v2586_v39 }
 0x1ca   : > { %3152 = vst [vmem:[#allocation52_spill] sm:$0xff] %v2607_v9  ;;  %v618_v22 = vsel %vm2599_vm1, %v588_v40, 0.0  ;;  %v1756_v13 = vsel %vm2599_vm1, 1.0, %v3106_v37 }
 0x1cb   : > { %3153 = vst [vmem:[#allocation53_spill] sm:$0xff] %v2610_v25  ;;  %v741_v21 = vmul.f32 %v710_v36, %v618_v22  ;;  %v843_v46 = vmul.f32 %v1756_v13, %v710_v36  ;;  %v975_v24 = vmul.f32 %v944_v28, %v618_v22  ;;  %v1076_v33 = vmul.f32 %v1756_v13, %v944_v28 }
 0x1cc   : > { %3154 = vst [vmem:[#allocation54_spill] sm:$0xff] %v2613_v15  ;;  %v1441_v0 = vmul.f32 %v1410_v61, %v618_v22  ;;  %v1542_v25 = vmul.f32 %v1756_v13, %v1410_v61 }
 0x1cd   : > { %3155 = vst [vmem:[#allocation55_spill] sm:$0xff] %v2616_v52  ;;  %v780_v52 = vsel %vm762_vm7, %v741_v21, 0.0  ;;  %v881_v54 = vsel %vm762_vm7, %v843_v46, 0.0  ;;  %v1013_v62 = vsel %vm762_vm7, %v975_v24, 0.0  ;;  %v1114_v40 = vsel %vm762_vm7, %v1076_v33, 0.0 }
 0x1ce   : > { %3156 = vst [vmem:[#allocation56_spill] sm:$0xff] %v2619_v57  ;;  %v1208_v57 = vmul.f32 %v1177_v10, %v618_v22  ;;  %v781_v9 = vadd.f32 %v780_v52, %v2562_v32  ;;  %v882_v38 = vadd.f32 %v881_v54, %v2565_v7  ;;  %v1014_v15 = vadd.f32 %v1013_v62, %v1012_v50  ;;  %v501_v52 = vpop.f32.mrf.mxu3  ;;  %v959_v54 = vld [vmem:[#allocation2 + $0x1b0] sm:$0xff] }
 0x1cf   : > { %3157 = vst [vmem:[#allocation57_spill] sm:$0xff] %v2622_v63  ;;  %v1309_v63 = vmul.f32 %v1756_v13, %v1177_v10  ;;  %v1115_v36 = vadd.f32 %v1114_v40, %v1113_v20  ;;  %v1479_v61 = vsel %vm762_vm7, %v1441_v0, 0.0  ;;  %v1580_v22 = vsel %vm762_vm7, %v1542_v25, 0.0  ;;  %v1417_v0 = vld [vmem:[#allocation2 + $0x350] sm:$0xff]  ;;  %v3160_v40 = vld [vmem:[#allocation14_spill] sm:$0xff] }
 0x1d0   : > { %v1246_v28 = vsel %vm762_vm7, %v1208_v57, 0.0  ;;  %v783_v13 = vadd.f32 %v2114_v30, %v781_v9  ;;  %v884_v21 = vadd.f32 %v2118_v34, %v882_v38  ;;  %v1016_v46 = vadd.f32 %v2121_v35, %v1014_v15 }
 0x1d1   : > { %v1347_v10 = vsel %vm762_vm7, %v1309_v63, 0.0  ;;  %v1117_v32 = vadd.f32 %v2126_v43, %v1115_v36  ;;  %v1247_v7 = vadd.f32 %v1246_v28, %v1245_v1  ;;  %v1480_v20 = vadd.f32 %v1479_v61, %v1478_v45  ;;  %v3161_v36 = vld [vmem:[#allocation15_spill] sm:$0xff] }
 0x1d2   : > { %v1348_v50 = vadd.f32 %v1347_v10, %v1346_v55  ;;  %v1581_v62 = vadd.f32 %v1580_v22, %v1579_v59  ;;  %v1083_v57 = vmul.f32 %v2596_v12, %v951_v11  ;;  %v1215_v63 = vmul.f32 %v1184_v4, %v2586_v39  ;;  %v3162_v10 = vld [vmem:[#allocation5_spill] sm:$0xff] }
 0x1d3   : > { %v785_v25 = vadd.f32 %v2169_v41, %v783_v13  ;;  %v886_v30 = vadd.f32 %v2172_v42, %v884_v21  ;;  %v1018_v34 = vadd.f32 %v2175_v27, %v1016_v46  ;;  %v1249_v35 = vadd.f32 %v2129_v44, %v1247_v7  ;;  %v480_v44 = vpop.f32.mrf.mxu2  ;;  %v1192_v22 = vld [vmem:[#allocation2 + $0x2a0] sm:$0xff]  ;;  %v3163_v21 = vld [vmem:[#allocation16_spill] sm:$0xff] }
 0x1d4   : > { %v1350_v43 = vadd.f32 %v2132_v47, %v1348_v50  ;;  %v1482_v1 = vadd.f32 %v2138_v51, %v1480_v20  ;;  %v1316_v45 = vmul.f32 %v2596_v12, %v1184_v4  ;;  %v1119_v55 = vadd.f32 %v2178_v29, %v1117_v32  ;;  %v3164_v46 = vld [vmem:[#allocation17_spill] sm:$0xff]  ;;  %v1425_v20 = vld [vmem:[#allocation2 + $0x390] sm:$0xff] }
 0x1d5   : > { %v1583_v59 = vadd.f32 %v2146_v60, %v1581_v62  ;;  %vm543_vm2 = vcmp.ne.f32.partialorder %v501_v52, %v501_v52  ;;  %v1448_v11 = vmul.f32 %v1417_v0, %v2586_v39  ;;  %v1251_v41 = vadd.f32 %v2181_v48, %v1249_v35  ;;  %v3166_v35 = vld [vmem:[#allocation28_spill] sm:$0xff] }
 0x1d6   : > { %v1352_v42 = vadd.f32 %v2184_v49, %v1350_v43  ;;  %v1484_v27 = vadd.f32 %v2194_v58, %v1482_v1  ;;  %v2662_v47 = vsel %vm762_vm7, %v748_v6, 0.0  ;;  %v1549_v51 = vmul.f32 %v2596_v12, %v1417_v0  ;;  %vm573_vm4 = vmxor %vm543_vm2, %vm1887_vm3  ;;  %v2708_v13 = vpop.f32.mrf.mxu3  ;;  %v3167_v1 = vld [vmem:[#allocation18_spill] sm:$0xff] }
 0x1d7   : > { %v787_v4 = vadd.f32 %v2220_v26, %v785_v25  ;;  %v603_v29 = vand.u32 2147483647, %v501_v52  ;;  %v2667_v60 = vsel %vm762_vm7, %v850_v8, 0.0  ;;  %v2670_v39 = vsel %vm762_vm7, %v982_v3, 0.0  ;;  %v725_v3 = vld [vmem:[#allocation2 + $0xc0] sm:$0xff] }
 0x1d8   : > { %v888_v48 = vadd.f32 %v2223_v56, %v886_v30  ;;  %v1020_v49 = vadd.f32 %v2226_v23, %v1018_v34  ;;  %v1121_v58 = vadd.f32 %v2229_v53, %v1119_v55  ;;  %v1253_v9 = vadd.f32 %v2232_v31, %v1251_v41 }
 0x1d9   : > { %v1585_v12 = vadd.f32 %v2201_v5, %v1583_v59  ;;  %vm536_vm5 = vcmp.ne.f32.partialorder %v480_v44, %v480_v44  ;;  %v2679_v26 = vsel %vm762_vm7, %v1083_v57, 0.0  ;;  %v2682_v15 = vsel %vm762_vm7, %v1215_v63, 0.0  ;;  %v718_v57 = vld [vmem:[#allocation2 + $0x88] sm:$0xff]  ;;  %v3165_v63 = vld [vmem:[#allocation27_spill] sm:$0xff] }
 0x1da   : > { %v1354_v6 = vadd.f32 %v2243_v2, %v1352_v42  ;;  %v1486_v56 = vadd.f32 %v2247_v14, %v1484_v27  ;;  %v789_v23 = vadd.f32 %v2318_v17, %v787_v4  ;;  %v633_v8 = vsel %vm573_vm4, %v603_v29, 0.0  ;;  %vm2700_vm6 = vmxor %vm536_vm5, %vm1887_vm3 }
 0x1db   : > { %v1771_v53 = vsel %vm573_vm4, 1.0, %v3106_v37  ;;  %v596_v31 = vand.u32 2147483647, %v480_v44  ;;  %v2689_v5 = vsel %vm762_vm7, %v1316_v45, 0.0  ;;  %v2692_v24 = vsel %vm762_vm7, %v1448_v11, 0.0  ;;  %v3168_v11 = vld [vmem:[#allocation29_spill] sm:$0xff] }
 0x1dc   : > { %v2695_v33 = vsel %vm762_vm7, %v1549_v51, 0.0  ;;  %v890_v2 = vadd.f32 %v2321_v16, %v888_v48  ;;  %v1022_v17 = vadd.f32 %v2324_v18, %v1020_v49  ;;  %v1123_v38 = vadd.f32 %v3160_v40, %v1121_v58  ;;  %v3169_v51 = vld [vmem:[#allocation30_spill] sm:$0xff] }
 0x1dd   : > { %v1255_v28 = vadd.f32 %v3161_v36, %v1253_v9  ;;  %v1587_v61 = vadd.f32 %v3162_v10, %v1585_v12  ;;  %v1356_v16 = vadd.f32 %v3163_v21, %v1354_v6  ;;  %v1488_v32 = vadd.f32 %v3164_v46, %v1486_v56  ;;  %v952_v9 = vld [vmem:[#allocation2 + $0x178] sm:$0xff]  ;;  %v3170_v56 = vld [vmem:[#allocation43_spill] sm:$0xff]  ;;  %v3174_v10 = vld [vmem:[#allocation45_spill] sm:$0xff] }
 0x1de   : > { %v756_v7 = vmul.f32 %v725_v3, %v633_v8  ;;  %v858_v50 = vmul.f32 %v1771_v53, %v725_v3  ;;  %v990_v62 = vmul.f32 %v959_v54, %v633_v8  ;;  %v1091_v52 = vmul.f32 %v1771_v53, %v959_v54  ;;  %v3173_v54 = vld [vmem:[#allocation32_spill] sm:$0xff]  ;;  %v3175_v46 = vld [vmem:[#allocation46_spill] sm:$0xff] }
 0x1df   : > { %v626_v18 = vsel %vm2700_vm6, %v596_v31, 0.0  ;;  %v791_v0 = vadd.f32 %v3165_v63, %v789_v23  ;;  %v1223_v25 = vmul.f32 %v1192_v22, %v633_v8  ;;  %v1324_v30 = vmul.f32 %v1771_v53, %v1192_v22  ;;  %v1185_v22 = vld [vmem:[#allocation2 + $0x268] sm:$0xff] }
 0x1e0   : > { %v1764_v34 = vsel %vm2700_vm6, 1.0, %v3106_v37  ;;  %v892_v43 = vadd.f32 %v3166_v35, %v890_v2  ;;  %v1589_v45 = vadd.f32 %v3167_v1, %v1587_v61  ;;  %v1456_v55 = vmul.f32 %v1425_v20, %v633_v8  ;;  %v3171_v8 = vld [vmem:[#allocation31_spill] sm:$0xff]  ;;  %v3172_v2 = vld [vmem:[#allocation44_spill] sm:$0xff] }
 0x1e1   : > { %v1557_v59 = vmul.f32 %v1771_v53, %v1425_v20  ;;  %v1024_v41 = vadd.f32 %v3168_v11, %v1022_v17  ;;  %v2722_v42 = vsel %vm762_vm7, %v756_v7, 0.0  ;;  %v2725_v27 = vsel %vm762_vm7, %v858_v50, 0.0  ;;  %v483_v17 = vpop.f32.mrf.mxu2  ;;  %v1418_v50 = vld [vmem:[#allocation2 + $0x358] sm:$0xff]  ;;  %v3176_v20 = vld [vmem:[#allocation33_spill] sm:$0xff] }
 0x1e2   : > { %v749_v44 = vmul.f32 %v718_v57, %v626_v18  ;;  %v1125_v4 = vadd.f32 %v3169_v51, %v1123_v38  ;;  %v2729_v29 = vsel %vm762_vm7, %v990_v62, 0.0  ;;  %v2732_v48 = vsel %vm762_vm7, %v1091_v52, 0.0  ;;  %v2757_v52 = vpop.f32.mrf.mxu3  ;;  %v3179_v35 = vld [vmem:[#allocation48_spill] sm:$0xff]  ;;  %v726_v51 = vld [vmem:[#allocation2 + $0xc8] sm:$0xff] }
 0x1e3   : > { %v793_v49 = vadd.f32 %v2526_v19, %v791_v0  ;;  %v851_v58 = vmul.f32 %v1764_v34, %v718_v57  ;;  %v2736_v12 = vsel %vm762_vm7, %v1223_v25, 0.0  ;;  %v2739_v6 = vsel %vm762_vm7, %v1324_v30, 0.0  ;;  %v3177_v57 = vld [vmem:[#allocation47_spill] sm:$0xff]  ;;  %v3178_v0 = vld [vmem:[#allocation34_spill] sm:$0xff] }
 0x1e4   : > { %v894_v23 = vadd.f32 %v3170_v56, %v892_v43  ;;  %v1257_v53 = vadd.f32 %v3171_v8, %v1255_v28  ;;  %v2744_v3 = vsel %vm762_vm7, %v1456_v55, 0.0  ;;  %v2747_v31 = vsel %vm762_vm7, %v1557_v59, 0.0 }
 0x1e5   : > { %v1026_v19 = vadd.f32 %v3172_v2, %v1024_v41  ;;  %v1358_v14 = vadd.f32 %v3173_v54, %v1356_v16  ;;  %v796_v40 = vsel %vm762_vm7, %v749_v44, 0.0  ;;  %v983_v38 = vmul.f32 %v952_v9, %v626_v18 }
 0x1e6   : > { %v1084_v36 = vmul.f32 %v1764_v34, %v952_v9  ;;  %v1127_v61 = vadd.f32 %v3174_v10, %v1125_v4  ;;  %v795_v28 = vadd.f32 %v2662_v47, %v793_v49  ;;  %v897_v21 = vsel %vm762_vm7, %v851_v58, 0.0  ;;  %v3182_v58 = vld [vmem:[#allocation49_spill] sm:$0xff] }
 0x1e7   : > { %v1259_v7 = vadd.f32 %v3175_v46, %v1257_v53  ;;  %v1490_v62 = vadd.f32 %v3176_v20, %v1488_v32  ;;  %v896_v16 = vadd.f32 %v2667_v60, %v894_v23  ;;  %v1360_v63 = vadd.f32 %v3177_v57, %v1358_v14  ;;  %v719_v14 = vld [vmem:[#allocation2 + $0x90] sm:$0xff]  ;;  %v2798_v46 = vld [vmem:[#allocation2 + $0x398] sm:$0xff]  ;;  %v1419_v57 = vld [vmem:[#allocation2 + $0x360] sm:$0xff] }
 0x1e8   : > { %v1591_v25 = vadd.f32 %v3178_v0, %v1589_v45  ;;  %vm544_vm8 = vcmp.ne.f32.partialorder %v2708_v13, %v2708_v13  ;;  %v1028_v47 = vadd.f32 %v2670_v39, %v1026_v19  ;;  %v1216_v30 = vmul.f32 %v1185_v22, %v626_v18 }
 0x1e9   : > { %v1492_v43 = vadd.f32 %v3179_v35, %v1490_v62  ;;  %vm2767_vm9 = vmxor %vm544_vm8, %vm1887_vm3  ;;  %v604_v32 = vand.u32 2147483647, %v2708_v13  ;;  %v1029_v60 = vsel %vm762_vm7, %v983_v38, 0.0  ;;  %v1129_v55 = vadd.f32 %v2679_v26, %v1127_v61  ;;  %v1193_v61 = vld [vmem:[#allocation2 + $0x2a8] sm:$0xff] }
 0x1ea   : > { %v1317_v45 = vmul.f32 %v1764_v34, %v1185_v22  ;;  %v1449_v59 = vmul.f32 %v1418_v50, %v626_v18  ;;  %v1130_v11 = vsel %vm762_vm7, %v1084_v36, 0.0  ;;  %v1261_v39 = vadd.f32 %v2682_v15, %v1259_v7  ;;  %v953_v22 = vld [vmem:[#allocation2 + $0x180] sm:$0xff] }
 0x1eb   : > { %v1550_v41 = vmul.f32 %v1764_v34, %v1418_v50  ;;  %v1772_v44 = vsel %vm2767_vm9, 1.0, %v3106_v37  ;;  %v797_v4 = vadd.f32 %v796_v40, %v795_v28  ;;  %v898_v49 = vadd.f32 %v897_v21, %v896_v16  ;;  %v960_v34 = vld [vmem:[#allocation2 + $0x1b8] sm:$0xff]  ;;  %v486_v40 = vpop.f32.mrf.mxu2  ;;  %v2801_v50 = vpop.f32.mrf.mxu3  ;;  %v1186_v16 = vld [vmem:[#allocation2 + $0x270] sm:$0xff] }
 0x1ec   : > { %v1362_v13 = vadd.f32 %v2689_v5, %v1360_v63  ;;  %v1593_v9 = vadd.f32 %v3182_v58, %v1591_v25  ;;  %v1030_v56 = vadd.f32 %v1029_v60, %v1028_v47  ;;  %v1262_v26 = vsel %vm762_vm7, %v1216_v30, 0.0 }
 0x1ed   : > { %v1494_v18 = vadd.f32 %v2692_v24, %v1492_v43  ;;  %v2785_v15 = vsel %vm2767_vm9, %v604_v32, 0.0  ;;  %v1131_v23 = vadd.f32 %v1130_v11, %v1129_v55  ;;  %v1363_v8 = vsel %vm762_vm7, %v1317_v45, 0.0 }
 0x1ee   : > { %v1495_v53 = vsel %vm762_vm7, %v1449_v59, 0.0  ;;  %v859_v2 = vmul.f32 %v1772_v44, %v726_v51  ;;  %v1263_v19 = vadd.f32 %v1262_v26, %v1261_v39  ;;  %v1596_v5 = vsel %vm762_vm7, %v1550_v41, 0.0 }
 0x1ef   : > { %vm537_vm10 = vcmp.ne.f32.partialorder %v483_v17, %v483_v17  ;;  %v597_v54 = vand.u32 2147483647, %v483_v17  ;;  %v1364_v38 = vadd.f32 %v1363_v8, %v1362_v13  ;;  %v1595_v24 = vadd.f32 %v2695_v33, %v1593_v9  ;;  %v954_v8 = vld [vmem:[#allocation2 + $0x188] sm:$0xff] }
 0x1f0   : > { %v2792_v36 = vmul.f32 %v726_v51, %v2785_v15  ;;  %v1092_v10 = vmul.f32 %v1772_v44, %v960_v34  ;;  %vm567_vm11 = vmxor %vm537_vm10, %vm1887_vm3  ;;  %v1496_v28 = vadd.f32 %v1495_v53, %v1494_v18  ;;  %v2796_v21 = vmul.f32 %v960_v34, %v2785_v15  ;;  %v720_v34 = vld [vmem:[#allocation2 + $0x98] sm:$0xff] }
 0x1f1   : > { %v627_v17 = vsel %vm567_vm11, %v597_v54, 0.0  ;;  %v1765_v7 = vsel %vm567_vm11, 1.0, %v3106_v37  ;;  %v2804_v33 = vsel %vm762_vm7, %v859_v2, 0.0  ;;  %vm538_vm12 = vcmp.ne.f32.partialorder %v486_v40, %v486_v40  ;;  %v1420_v54 = vld [vmem:[#allocation2 + $0x368] sm:$0xff] }
 0x1f2   : > { %v750_v20 = vmul.f32 %v719_v14, %v627_v17  ;;  %v852_v62 = vmul.f32 %v1765_v7, %v719_v14  ;;  %v2807_v63 = vmul.f32 %v1193_v61, %v2785_v15  ;;  %v1325_v0 = vmul.f32 %v1772_v44, %v1193_v61  ;;  %vm568_vm13 = vmxor %vm538_vm12, %vm1887_vm3 }
 0x1f3   : > { %v984_v25 = vmul.f32 %v953_v22, %v627_v17  ;;  %v1085_v47 = vmul.f32 %v1765_v7, %v953_v22  ;;  %v1597_v30 = vadd.f32 %v1596_v5, %v1595_v24  ;;  %v2810_v35 = vsel %vm762_vm7, %v1092_v10, 0.0 }
 0x1f4   : > { %v1558_v43 = vmul.f32 %v1772_v44, %v2798_v46  ;;  %v598_v1 = vand.u32 2147483647, %v486_v40  ;;  %v1217_v32 = vmul.f32 %v1186_v16, %v627_v17  ;;  %v1318_v60 = vmul.f32 %v1765_v7, %v1186_v16 }
 0x1f5   : > { %v1450_v55 = vmul.f32 %v1419_v57, %v627_v17  ;;  %v1551_v45 = vmul.f32 %v1765_v7, %v1419_v57  ;;  %v798_v59 = vsel %vm762_vm7, %v750_v20, 0.0  ;;  %v899_v11 = vsel %vm762_vm7, %v852_v62, 0.0  ;;  %v513_v17 = vpop.f32.mrf.mxu3 }
 0x1f6   : > { %vm545_vm14 = vcmp.ne.f32.partialorder %v2757_v52, %v2757_v52  ;;  %v605_v39 = vand.u32 2147483647, %v2757_v52  ;;  %v799_v41 = vadd.f32 %v798_v59, %v797_v4  ;;  %v900_v51 = vadd.f32 %v899_v11, %v898_v49  ;;  %v1187_v49 = vld [vmem:[#allocation2 + $0x278] sm:$0xff] }
 0x1f7   : > { %v1031_v44 = vsel %vm762_vm7, %v984_v25, 0.0  ;;  %v1132_v13 = vsel %vm762_vm7, %v1085_v47, 0.0  ;;  %v628_v26 = vsel %vm568_vm13, %v598_v1, 0.0  ;;  %v1766_v18 = vsel %vm568_vm13, 1.0, %v3106_v37  ;;  %vm575_vm15 = vmxor %vm545_vm14, %vm1887_vm3  ;;  %v727_v1 = vld [vmem:[#allocation2 + $0xd0] sm:$0xff] }
 0x1f8   : > { %v1032_v58 = vadd.f32 %v1031_v44, %v1030_v56  ;;  %v1133_v9 = vadd.f32 %v1132_v13, %v1131_v23  ;;  %v1264_v53 = vsel %vm762_vm7, %v1217_v32, 0.0  ;;  %v1365_v2 = vsel %vm762_vm7, %v1318_v60, 0.0 }
 0x1f9   : > { %v1497_v5 = vsel %vm762_vm7, %v1450_v55, 0.0  ;;  %v1598_v4 = vsel %vm762_vm7, %v1551_v45, 0.0  ;;  %v1265_v14 = vadd.f32 %v1264_v53, %v1263_v19  ;;  %v1366_v40 = vadd.f32 %v1365_v2, %v1364_v38  ;;  %v3184_v2 = vld [vmem:[#allocation8_spill] sm:$0xff] }
 0x1fa   : > { %v1498_v24 = vadd.f32 %v1497_v5, %v1496_v28  ;;  %v1599_v56 = vadd.f32 %v1598_v4, %v1597_v30  ;;  %v751_v23 = vmul.f32 %v720_v34, %v628_v26  ;;  %v853_v10 = vmul.f32 %v1766_v18, %v720_v34  ;;  %v3185_v4 = vld [vmem:[#allocation10_spill] sm:$0xff] }
 0x1fb   : > { %v985_v61 = vmul.f32 %v954_v8, %v628_v26  ;;  %v1086_v22 = vmul.f32 %v1766_v18, %v954_v8  ;;  %v1218_v7 = vmul.f32 %v1187_v49, %v628_v26  ;;  %v1319_v20 = vmul.f32 %v1766_v18, %v1187_v49  ;;  %v2866_v49 = vld [vmem:[#allocation2 + $0x3a0] sm:$0xff] }
 0x1fc   : > { %v1451_v62 = vmul.f32 %v1420_v54, %v628_v26  ;;  %v1552_v16 = vmul.f32 %v1766_v18, %v1420_v54  ;;  %v2830_v57 = vsel %vm575_vm15, %v605_v39, 0.0  ;;  %v1773_v19 = vsel %vm575_vm15, 1.0, %v3106_v37  ;;  %v3204_v54 = vld [vmem:[#allocation25_spill] sm:$0xff] }
 0x1fd   : > { %v800_v38 = vsel %vm762_vm7, %v751_v23, 0.0  ;;  %v1033_v28 = vsel %vm762_vm7, %v985_v61, 0.0  ;;  %v901_v52 = vsel %vm762_vm7, %v853_v10, 0.0  ;;  %v1134_v30 = vsel %vm762_vm7, %v1086_v22, 0.0  ;;  %v3189_v23 = vld [vmem:[#allocation9_spill] sm:$0xff]  ;;  %v3190_v61 = vld [vmem:[#allocation23_spill] sm:$0xff] }
 0x1fe   : > { %v801_v25 = vadd.f32 %v800_v38, %v799_v41  ;;  %v1034_v47 = vadd.f32 %v1033_v28, %v1032_v58  ;;  %v1266_v32 = vsel %vm762_vm7, %v1218_v7, 0.0  ;;  %v1367_v60 = vsel %vm762_vm7, %v1319_v20, 0.0  ;;  %v961_v41 = vld [vmem:[#allocation2 + $0x1c0] sm:$0xff]  ;;  %v3191_v7 = vld [vmem:[#allocation11_spill] sm:$0xff] }
 0x1ff   : > { %v1499_v55 = vsel %vm762_vm7, %v1451_v62, 0.0  ;;  %v1600_v45 = vsel %vm762_vm7, %v1552_v16, 0.0  ;;  %v2842_v59 = vsel %vm762_vm7, %v1325_v0, 0.0  ;;  %v2846_v11 = vmul.f32 %v2798_v46, %v2785_v15  ;;  %v1194_v46 = vld [vmem:[#allocation2 + $0x2b0] sm:$0xff]  ;;  %v516_v16 = vpop.f32.mrf.mxu3 }
 0x200   : > { %v2849_v39 = vsel %vm762_vm7, %v1558_v43, 0.0  ;;  %vm546_vm0 = vcmp.ne.f32.partialorder %v2801_v50, %v2801_v50  ;;  %v902_v44 = vadd.f32 %v901_v52, %v900_v51  ;;  %v1135_v13 = vadd.f32 %v1134_v30, %v1133_v9  ;;  %v3183_v43 = vld [vmem:[#allocation6_spill] sm:$0xff]  ;;  %v3196_v30 = vld [vmem:[#allocation19_spill] sm:$0xff] }
 0x201   : > { %v1267_v58 = vadd.f32 %v1266_v32, %v1265_v14  ;;  %v1368_v26 = vadd.f32 %v1367_v60, %v1366_v40  ;;  %v2854_v18 = vmul.f32 %v727_v1, %v2830_v57  ;;  %v2856_v0 = vmul.f32 %v1773_v19, %v727_v1  ;;  %vm2872_vm1 = vmxor %vm546_vm0, %vm1887_vm3  ;;  %v3197_v32 = vld [vmem:[#allocation21_spill] sm:$0xff] }
 0x202   : > { %v1500_v34 = vadd.f32 %v1499_v55, %v1498_v24  ;;  %v1601_v8 = vadd.f32 %v1600_v45, %v1599_v56  ;;  %v2859_v15 = vmul.f32 %v961_v41, %v2830_v57  ;;  %v803_v53 = vadd.f32 %v3183_v43, %v801_v25  ;;  %v3188_v24 = vld [vmem:[#allocation7_spill] sm:$0xff]  ;;  %v3195_v25 = vld [vmem:[#allocation13_spill] sm:$0xff]  ;;  %v728_v45 = vld [vmem:[#allocation2 + $0xd8] sm:$0xff] }
 0x203   : > { %v1036_v5 = vadd.f32 %v3184_v2, %v1034_v47  ;;  %v1269_v51 = vadd.f32 %v3185_v4, %v1267_v58  ;;  %v2864_v9 = vmul.f32 %v1773_v19, %v961_v41  ;;  %v606_v14 = vand.u32 2147483647, %v2801_v50  ;;  %v3194_v50 = vld [vmem:[#allocation12_spill] sm:$0xff]  ;;  %v3203_v4 = vld [vmem:[#allocation39_spill] sm:$0xff] }
 0x204   : > { %vm547_vm2 = vcmp.ne.f32.partialorder %v513_v17, %v513_v17  ;;  %v607_v40 = vand.u32 2147483647, %v513_v17  ;;  %v904_v56 = vadd.f32 %v3188_v24, %v902_v44  ;;  %v1137_v10 = vadd.f32 %v3189_v23, %v1135_v13  ;;  %v1195_v41 = vld [vmem:[#allocation2 + $0x2b8] sm:$0xff]  ;;  %v962_v13 = vld [vmem:[#allocation2 + $0x1c8] sm:$0xff] }
 0x205   : > { %v1271_v22 = vadd.f32 %v3190_v61, %v1269_v51  ;;  %v1370_v20 = vadd.f32 %v3191_v7, %v1368_v26  ;;  %vm2882_vm4 = vmxor %vm547_vm2, %vm1887_vm3  ;;  %v1225_v38 = vmul.f32 %v1194_v46, %v2830_v57  ;;  %v2887_v28 = vmul.f32 %v1773_v19, %v1194_v46  ;;  %v1196_v26 = vld [vmem:[#allocation2 + $0x2c0] sm:$0xff]  ;;  %v3199_v46 = vld [vmem:[#allocation22_spill] sm:$0xff] }
 0x206   : > { %v1502_v17 = vadd.f32 %v3194_v50, %v1500_v34  ;;  %v1603_v52 = vadd.f32 %v3195_v25, %v1601_v8  ;;  %v2892_v47 = vmul.f32 %v1773_v19, %v2866_v49  ;;  %v805_v1 = vadd.f32 %v3196_v30, %v803_v53  ;;  %v3198_v34 = vld [vmem:[#allocation20_spill] sm:$0xff]  ;;  %v1197_v23 = vld [vmem:[#allocation2 + $0x2c8] sm:$0xff]  ;;  %v2939_v50 = vld [vmem:[#allocation2 + $0x1d0] sm:$0xff] }
 0x207   : > { %v1038_v60 = vadd.f32 %v3197_v32, %v1036_v5  ;;  %v2898_v55 = vsel %vm2872_vm1, %v606_v14, 0.0  ;;  %v2903_v44 = vsel %vm2872_vm1, 1.0, %v3106_v37  ;;  %v2907_v19 = vsel %vm2882_vm4, %v607_v40, 0.0  ;;  %v3200_v53 = vld [vmem:[#allocation24_spill] sm:$0xff]  ;;  %v3205_v40 = vld [vmem:[#allocation26_spill] sm:$0xff]  ;;  %v3208_v32 = vld [vmem:[#allocation37_spill] sm:$0xff] }
 0x208   : > { %vm548_vm5 = vcmp.ne.f32.partialorder %v516_v16, %v516_v16  ;;  %v608_v58 = vand.u32 2147483647, %v516_v16  ;;  %v2910_v8 = vadd.f32 %v3198_v34, %v904_v56  ;;  %v1139_v43 = vadd.f32 %v3199_v46, %v1137_v10 }
 0x209   : > { %v1372_v2 = vadd.f32 %v3200_v53, %v1370_v20  ;;  %vm2915_vm6 = vmxor %vm548_vm5, %vm1887_vm3  ;;  %v1273_v51 = vadd.f32 %v3203_v4, %v1271_v22  ;;  %v2921_v14 = vadd.f32 %v3204_v54, %v1502_v17  ;;  %v2924_v24 = vadd.f32 %v3205_v40, %v1603_v52  ;;  %v3207_v20 = vld [vmem:[#allocation54_spill] sm:$0xff]  ;;  %v2947_v52 = vld [vmem:[#allocation2 + $0x1d8] sm:$0xff] }
 0x20a   : > { %v2928_v56 = vsel %vm2915_vm6, %v608_v58, 0.0  ;;  %v1226_v10 = vmul.f32 %v1195_v41, %v2898_v55  ;;  %v2932_v61 = vmul.f32 %v2903_v44, %v728_v45  ;;  %v2935_v7 = vmul.f32 %v2903_v44, %v962_v13  ;;  %v2968_v40 = vld [vmem:[#allocation2 + $0xe0] sm:$0xff] }
 0x20b   : > { %3206 = vst [vmem:[#allocation14_spill] sm:$0xff] %v2928_v56  ;;  %v1227_v22 = vmul.f32 %v1196_v26, %v2907_v19  ;;  %v1275_v16 = vadd.f32 %v3207_v20, %v1273_v51  ;;  %v1327_v17 = vmul.f32 %v2903_v44, %v1195_v41  ;;  %v2945_v25 = vsel %vm2882_vm4, 1.0, %v3106_v37 }
 0x20c   : > { %v993_v30 = vmul.f32 %v962_v13, %v2898_v55  ;;  %v1040_v58 = vadd.f32 %v3208_v32, %v1038_v60  ;;  %v1228_v34 = vmul.f32 %v1197_v23, %v2928_v56  ;;  %v1278_v53 = vsel %vm762_vm7, %v2807_v63, 0.0  ;;  %v3209_v60 = vld [vmem:[#allocation52_spill] sm:$0xff]  ;;  %v2977_v32 = vld [vmem:[#allocation2 + $0xe8] sm:$0xff] }
 0x20d   : > { %v1277_v46 = vadd.f32 %v2736_v12, %v1275_v16  ;;  %v1280_v41 = vsel %vm762_vm7, %v1225_v38, 0.0  ;;  %v2959_v62 = vsel %vm2915_vm6, 1.0, %v3106_v37  ;;  %v1282_v4 = vsel %vm762_vm7, %v1226_v10, 0.0  ;;  %v3210_v38 = vld [vmem:[#allocation35_spill] sm:$0xff] }
 0x20e   : > { %v994_v13 = vmul.f32 %v2939_v50, %v2907_v19  ;;  %v1042_v51 = vadd.f32 %v3209_v60, %v1040_v58  ;;  %v1284_v12 = vsel %vm762_vm7, %v1227_v22, 0.0  ;;  %v995_v63 = vmul.f32 %v2947_v52, %v2928_v56 }
 0x20f   : > { %v1279_v54 = vadd.f32 %v1278_v53, %v1277_v46  ;;  %v807_v20 = vadd.f32 %v3210_v38, %v805_v1  ;;  %v1045_v5 = vsel %vm762_vm7, %v2796_v21, 0.0  ;;  %v1047_v10 = vsel %vm762_vm7, %v2859_v15, 0.0  ;;  %v3211_v53 = vld [vmem:[#allocation50_spill] sm:$0xff] }
 0x210   : > { %v1044_v37 = vadd.f32 %v2729_v29, %v1042_v51  ;;  %v1049_v16 = vsel %vm762_vm7, %v993_v30, 0.0  ;;  %v1286_v58 = vsel %vm762_vm7, %v1228_v34, 0.0  ;;  %v759_v46 = vmul.f32 %v728_v45, %v2898_v55  ;;  %v3212_v51 = vld [vmem:[#allocation40_spill] sm:$0xff] }
 0x211   : > { %v1281_v22 = vadd.f32 %v1280_v41, %v1279_v54  ;;  %v809_v60 = vadd.f32 %v3211_v53, %v807_v20  ;;  %v1051_v29 = vsel %vm762_vm7, %v994_v13, 0.0  ;;  %v760_v21 = vmul.f32 %v2968_v40, %v2907_v19  ;;  %v3213_v20 = vld [vmem:[#allocation55_spill] sm:$0xff] }
 0x212   : > { %v1046_v1 = vadd.f32 %v1045_v5, %v1044_v37  ;;  %v1374_v38 = vadd.f32 %v3212_v51, %v1372_v2  ;;  %v1053_v30 = vsel %vm762_vm7, %v995_v63, 0.0  ;;  %v761_v41 = vmul.f32 %v2977_v32, %v2928_v56 }
 0x213   : > { %v1283_v15 = vadd.f32 %v1282_v4, %v1281_v22  ;;  %v811_v34 = vadd.f32 %v2722_v42, %v809_v60  ;;  %v812_v45 = vsel %vm762_vm7, %v2792_v36, 0.0  ;;  %v814_v13 = vsel %vm762_vm7, %v2854_v18, 0.0  ;;  %v3214_v4 = vld [vmem:[#allocation38_spill] sm:$0xff]  ;;  %v3215_v18 = vld [vmem:[#allocation53_spill] sm:$0xff] }
 0x214   : > { %v1048_v54 = vadd.f32 %v1047_v10, %v1046_v1  ;;  %v1376_v37 = vadd.f32 %v3213_v20, %v1374_v38  ;;  %v816_v2 = vsel %vm762_vm7, %v759_v46, 0.0  ;;  %v1141_v63 = vadd.f32 %v3214_v4, %v1139_v43 }
 0x215   : > { %v1285_v5 = vadd.f32 %v1284_v12, %v1283_v15  ;;  %v813_v53 = vadd.f32 %v812_v45, %v811_v34  ;;  %v818_v51 = vsel %vm762_vm7, %v760_v21, 0.0  ;;  %v1328_v42 = vmul.f32 %v2945_v25, %v1196_v26 }
 0x216   : > { %v1050_v22 = vadd.f32 %v1049_v16, %v1048_v54  ;;  %v1378_v10 = vadd.f32 %v2739_v6, %v1376_v37  ;;  %v820_v1 = vsel %vm762_vm7, %v761_v41, 0.0  ;;  %v1143_v56 = vadd.f32 %v3215_v18, %v1141_v63  ;;  %v3217_v54 = vld [vmem:[#allocation51_spill] sm:$0xff] }
 0x217   : > { %v1287_v60 = vadd.f32 %v1286_v58, %v1285_v5  ;;  %v815_v36 = vadd.f32 %v814_v13, %v813_v53  ;;  %v1329_v12 = vmul.f32 %v2959_v62, %v1197_v23  ;;  %v1381_v43 = vsel %vm762_vm7, %v2887_v28, 0.0  ;;  %v3216_v58 = vld [vmem:[#allocation36_spill] sm:$0xff] }
 0x218   : > { %v1052_v38 = vadd.f32 %v1051_v29, %v1050_v22  ;;  %v1380_v46 = vadd.f32 %v2842_v59, %v1378_v10  ;;  %v1383_v26 = vsel %vm762_vm7, %v1327_v17, 0.0  ;;  %v1145_v6 = vadd.f32 %v2732_v48, %v1143_v56 }
 0x219   : > { %1288 = vadd.xlane.f32.xlu2 %v1287_v60  ;;  %v817_v16 = vadd.f32 %v816_v2, %v815_v36  ;;  %v908_v21 = vadd.f32 %v3216_v58, %v2910_v8  ;;  %v1385_v29 = vsel %vm762_vm7, %v1328_v42, 0.0  ;;  %v1095_v23 = vmul.f32 %v2945_v25, %v2939_v50  ;;  %v3219_v2 = vld [vmem:[#allocation57_spill] sm:$0xff] }
 0x21a   : > { %v1054_v15 = vadd.f32 %v1053_v30, %v1052_v38  ;;  %v1382_v41 = vadd.f32 %v1381_v43, %v1380_v46  ;;  %v1096_v28 = vmul.f32 %v2959_v62, %v2947_v52  ;;  %v1147_v34 = vadd.f32 %v2810_v35, %v1145_v6  ;;  %v3218_v30 = vld [vmem:[#allocation42_spill] sm:$0xff] }
 0x21b   : > { %v819_v59 = vadd.f32 %v818_v51, %v817_v16  ;;  %v910_v17 = vadd.f32 %v3217_v54, %v908_v21  ;;  %v1387_v56 = vsel %vm762_vm7, %v1329_v12, 0.0  ;;  %v1148_v8 = vsel %vm762_vm7, %v2864_v9, 0.0  ;;  %v1428_v35 = vld [vmem:[#allocation2 + $0x3a8] sm:$0xff]  ;;  %v1429_v51 = vld [vmem:[#allocation2 + $0x3b0] sm:$0xff] }
 0x21c   : > { %1055 = vadd.xlane.f32.xlu1 %v1054_v15  ;;  %v1384_v48 = vadd.f32 %v1383_v26, %v1382_v41  ;;  %v1607_v45 = vadd.f32 %v3218_v30, %v2924_v24  ;;  %v1149_v50 = vadd.f32 %v1148_v8, %v1147_v34  ;;  %v1150_v20 = vsel %vm762_vm7, %v2935_v7, 0.0 }
 0x21d   : > { %v821_v13 = vadd.f32 %v820_v1, %v819_v59  ;;  %v912_v52 = vadd.f32 %v2725_v27, %v910_v17  ;;  %v1152_v5 = vsel %vm762_vm7, %v1095_v23, 0.0  ;;  %v862_v53 = vmul.f32 %v2945_v25, %v2968_v40  ;;  %v3220_v40 = vld [vmem:[#allocation41_spill] sm:$0xff]  ;;  %v3222_v23 = vld [vmem:[#allocation14_spill] sm:$0xff] }
 0x21e   : > { %v1386_v37 = vadd.f32 %v1385_v29, %v1384_v48  ;;  %v1609_v4 = vadd.f32 %v3219_v2, %v1607_v45  ;;  %v1151_v9 = vadd.f32 %v1150_v20, %v1149_v50  ;;  %v1154_v24 = vsel %vm762_vm7, %v1096_v28, 0.0 }
 0x21f   : > { %822 = vadd.xlane.f32.xlu0 %v821_v13  ;;  %v863_v63 = vmul.f32 %v2959_v62, %v2977_v32  ;;  %v914_v7 = vadd.f32 %v2804_v33, %v912_v52  ;;  %v915_v27 = vsel %vm762_vm7, %v2856_v0, 0.0  ;;  %v1506_v10 = vadd.f32 %v3220_v40, %v2921_v14  ;;  %v1430_v32 = vld [vmem:[#allocation2 + $0x3b8] sm:$0xff] }
 0x220   : > { %v1388_v22 = vadd.f32 %v1387_v56, %v1386_v37  ;;  %v1611_v42 = vadd.f32 %v2747_v31, %v1609_v4  ;;  %v1458_v60 = vmul.f32 %v2866_v49, %v2830_v57  ;;  %v1560_v36 = vmul.f32 %v2903_v44, %v1428_v35  ;;  %v3221_v31 = vld [vmem:[#allocation56_spill] sm:$0xff] }
 0x221   : > { %v1153_v1 = vadd.f32 %v1152_v5, %v1151_v9  ;;  %v916_v18 = vadd.f32 %v915_v27, %v914_v7  ;;  %v917_v33 = vsel %vm762_vm7, %v2932_v61, 0.0  ;;  %v919_v0 = vsel %vm762_vm7, %v862_v53, 0.0 }
 0x222   : > { %1389 = vadd.xlane.f32.xlu2 %v1388_v22  ;;  %v1613_v38 = vadd.f32 %v2849_v39, %v1611_v42  ;;  %v1508_v12 = vadd.f32 %v3221_v31, %v1506_v10  ;;  %v1561_v43 = vmul.f32 %v2945_v25, %v1429_v51  ;;  %v1614_v57 = vsel %vm762_vm7, %v2892_v47, 0.0 }
 0x223   : > { %v1155_v46 = vadd.f32 %v1154_v24, %v1153_v1  ;;  %v918_v14 = vadd.f32 %v917_v33, %v916_v18  ;;  %v921_v49 = vsel %vm762_vm7, %v863_v63, 0.0  ;;  %v1562_v44 = vmul.f32 %v2959_v62, %v1430_v32 }
 0x224   : > { %v1615_v16 = vadd.f32 %v1614_v57, %v1613_v38  ;;  %v1510_v61 = vadd.f32 %v2744_v3, %v1508_v12  ;;  %v1511_v26 = vsel %vm762_vm7, %v2846_v11, 0.0  ;;  %v1459_v39 = vmul.f32 %v1428_v35, %v2898_v55 }
 0x225   : > { %1156 = vadd.xlane.f32.xlu1 %v1155_v46  ;;  %v920_v6 = vadd.f32 %v919_v0, %v918_v14  ;;  %v1616_v58 = vsel %vm762_vm7, %v1560_v36, 0.0  ;;  %v1618_v47 = vsel %vm762_vm7, %v1561_v43, 0.0  ;;  %v1460_v41 = vmul.f32 %v1429_v51, %v2907_v19 }
 0x226   : > { %v1617_v25 = vadd.f32 %v1616_v58, %v1615_v16  ;;  %v1512_v21 = vadd.f32 %v1511_v26, %v1510_v61  ;;  %v1513_v62 = vsel %vm762_vm7, %v1458_v60, 0.0  ;;  %v1620_v3 = vsel %vm762_vm7, %v1562_v44, 0.0 }
 0x227   : > { %v922_v15 = vadd.f32 %v921_v49, %v920_v6  ;;  %v1461_v11 = vmul.f32 %v1430_v32, %v3222_v23  ;;  %v1515_v55 = vsel %vm762_vm7, %v1459_v39, 0.0  ;;  %v1517_v54 = vsel %vm762_vm7, %v1460_v41, 0.0 }
 0x228   : > { %v1619_v29 = vadd.f32 %v1618_v47, %v1617_v25  ;;  %v1514_v59 = vadd.f32 %v1513_v62, %v1512_v21 }
 0x229   : > { %923 = vadd.xlane.f32.xlu0 %v922_v15  ;;  %v1519_v48 = vsel %vm762_vm7, %v1461_v11, 0.0 }
 0x22a   : > { %v1516_v28 = vadd.f32 %v1515_v55, %v1514_v59  ;;  %v1621_v34 = vadd.f32 %v1620_v3, %v1619_v29  ;;  %v699_v59 = vlaneseq }
 0x22c   : > { %v1518_v17 = vadd.f32 %v1517_v54, %v1516_v28  ;;  %v700_v55 = vand.u32 127, %v699_v59 }
 0x22d   : > { %1622 = vadd.xlane.f32.xlu1 %v1621_v34 }
 0x22e   : > { %v1520_v19 = vadd.f32 %v1519_v48, %v1518_v17  ;;  %vm731_vm3 = vcmp.eq.s32.totalorder %v700_v55, 0  ;;  %vm833_vm7 = vcmp.eq.s32.totalorder %v700_v55, 4  ;;  %vm965_vm8 = vcmp.eq.s32.totalorder %v700_v55, 1 }
 0x22f   : > { %vm1066_vm9 = vcmp.eq.s32.totalorder %v700_v55, 5  ;;  %vm1198_vm10 = vcmp.eq.s32.totalorder %v700_v55, 2  ;;  %vm1299_vm11 = vcmp.eq.s32.totalorder %v700_v55, 6  ;;  %vm1431_vm12 = vcmp.eq.s32.totalorder %v700_v55, 3 }
 0x230   : > { %vm1532_vm13 = vcmp.eq.s32.totalorder %v700_v55, 7 }
 0x231   : > { %1521 = vadd.xlane.f32.xlu0 %v1520_v19 }
 0x28c   : > { %v1289_v56 = vpop.xlane.xlu2 %1288 }
 0x28d   : > { %v1290_v52 = vrot.slane %v1289_v56, 4 }
 0x28f   : > { %v1056_v8 = vpop.xlane.xlu1 %1055  ;;  %v1291_v24 = vadd.f32 %v1290_v52, %v1289_v56 }
 0x290   : > { %v1057_v13 = vrot.slane %v1056_v8, 4 }
 0x291   : > { %v1292_v60 = vrot.slane %v1291_v24, 2 }
 0x292   : > { %v823_v30 = vpop.xlane.xlu0 %822  ;;  %v1058_v5 = vadd.f32 %v1057_v13, %v1056_v8 }
 0x293   : > { %v824_v45 = vrot.slane %v823_v30, 4  ;;  %v1293_v31 = vadd.f32 %v1292_v60, %v1291_v24 }
 0x294   : > { %v1059_v22 = vrot.slane %v1058_v5, 2 }
 0x295   : > { %v825_v50 = vadd.f32 %v824_v45, %v823_v30  ;;  %v1390_v20 = vpop.xlane.xlu2 %1389  ;;  %v1294_v26 = vrot.slane %v1293_v31, 1 }
 0x296   : > { %v1391_v35 = vrot.slane %v1390_v20, 4  ;;  %v1060_v32 = vadd.f32 %v1059_v22, %v1058_v5 }
 0x297   : > { %v826_v37 = vrot.slane %v825_v50, 2  ;;  %v1295_v41 = vadd.f32 %v1294_v26, %v1293_v31 }
 0x298   : > { %v1157_v53 = vpop.xlane.xlu1 %1156  ;;  %v1392_v2 = vadd.f32 %v1391_v35, %v1390_v20  ;;  %v1061_v57 = vrot.slane %v1060_v32, 1 }
 0x299   : > { %v1158_v4 = vrot.slane %v1157_v53, 4  ;;  %v827_v9 = vadd.f32 %v826_v37, %v825_v50 }
 0x29a   : > { %v1393_v51 = vrot.slane %v1392_v2, 2  ;;  %v1062_v21 = vadd.f32 %v1061_v57, %v1060_v32 }
 0x29b   : > { %v1159_v63 = vadd.f32 %v1158_v4, %v1157_v53  ;;  %v828_v7 = vrot.slane %v827_v9, 1 }
 0x29c   : > { %v924_v27 = vpop.xlane.xlu0 %923  ;;  %v1394_v33 = vadd.f32 %v1393_v51, %v1392_v2 }
 0x29d   : > { %v1160_v42 = vrot.slane %v1159_v63, 2  ;;  %v925_v40 = vrot.slane %v924_v27, 4  ;;  %v829_v10 = vadd.f32 %v828_v7, %v827_v9 }
 0x29e   : > { %v1395_v61 = vrot.slane %v1394_v33, 1 }
 0x29f   : > { %v926_v36 = vadd.f32 %v925_v40, %v924_v27  ;;  %1803 = vpush %v829_v10  ;;  %v1161_v1 = vadd.f32 %v1160_v42, %v1159_v63 }
 0x2a0   : > { %v1623_v18 = vpop.xlane.xlu1 %1622  ;;  %v1396_v47 = vadd.f32 %v1395_v61, %v1394_v33 }
 0x2a1   : > { %v927_v0 = vrot.slane %v926_v36, 2  ;;  %v1624_v38 = vrot.slane %v1623_v18, 4  ;;  %v1162_v14 = vrot.slane %v1161_v1, 1 }
 0x2a3   : > { %v1625_v12 = vadd.f32 %v1624_v38, %v1623_v18  ;;  %v928_v46 = vadd.f32 %v927_v0, %v926_v36  ;;  %v1163_v25 = vadd.f32 %v1162_v14, %v1161_v1 }
 0x2a4   : > { %v1522_v43 = vpop.xlane.xlu0 %1521 }
 0x2a5   : > { %v1626_v49 = vrot.slane %v1625_v12, 2  ;;  %v1523_v44 = vrot.slane %v1522_v43, 4  ;;  %v929_v16 = vrot.slane %v928_v46, 1 }
 0x2a7   : > { %v1627_v39 = vadd.f32 %v1626_v49, %v1625_v12  ;;  %v1524_v6 = vadd.f32 %v1523_v44, %v1522_v43  ;;  %v930_v58 = vadd.f32 %v929_v16, %v928_v46 }
 0x2a9   : > { %v1525_v15 = vrot.slane %v1524_v6, 2  ;;  %1805 = vpush %v930_v58  ;;  %v1628_v62 = vrot.slane %v1627_v39, 1 }
 0x2aa   : > { %1807 = vpush %v1062_v21 }
 0x2ab   : > { %v1526_v29 = vadd.f32 %v1525_v15, %v1524_v6  ;;  %1809 = vpush %v1163_v25  ;;  %v1629_v23 = vadd.f32 %v1628_v62, %v1627_v39 }
 0x2ac   : > { %1811 = vpush %v1295_v41 }
 0x2ad   : > { %1813 = vpush %v1396_v47  ;;  %v1527_v3 = vrot.slane %v1526_v29, 1 }
 0x2af   : > { %v1528_v11 = vadd.f32 %v1527_v3, %v1526_v29 }
 0x2b1   : > { %1815 = vpush %v1528_v11 }
 0x2b2   : > { %1817 = vpush %v1629_v23 }
 0x2d0   : > { %s1804_s21 = spop %1803 }
 0x2d1   : > { %v831_v28 = vstv %s1804_s21 }
 0x2d2   : > { %v832_v34 = vsel %vm731_vm3, %v831_v28, 0.0 }
 0x2da   : > { %s1806_s22 = spop %1805 }
 0x2db   : > { %v932_v54 = vstv %s1806_s22  ;;  %s1808_s23 = spop %1807 }
 0x2dc   : > { %v933_v17 = vsel %vm833_vm7, %v932_v54, %v832_v34  ;;  %v1064_v48 = vstv %s1808_s23  ;;  %s1810_s24 = spop %1809 }
 0x2dd   : > { %v1065_v19 = vsel %vm965_vm8, %v1064_v48, %v933_v17  ;;  %v1165_v56 = vstv %s1810_s24  ;;  %s1812_s25 = spop %1811 }
 0x2de   : > { %v1166_v8 = vsel %vm1066_vm9, %v1165_v56, %v1065_v19  ;;  %v1297_v30 = vstv %s1812_s25  ;;  %s1814_s26 = spop %1813 }
 0x2df   : > { %v1298_v45 = vsel %vm1198_vm10, %v1297_v30, %v1166_v8  ;;  %v1398_v13 = vstv %s1814_s26 }
 0x2e0   : > { %v1399_v50 = vsel %vm1299_vm11, %v1398_v13, %v1298_v45 }
 0x2e2   : > { %s1816_s28 = spop %1815 }
 0x2e3   : > { %v1530_v20 = vstv %s1816_s28  ;;  %s1818_s6 = spop %1817 }
 0x2e4   : > { %v1531_v52 = vsel %vm1431_vm12, %v1530_v20, %v1399_v50  ;;  %v1631_v35 = vstv %s1818_s6 }
 0x2e5   : > { %v1632_v37 = vsel %vm1532_vm13, %v1631_v35, %v1531_v52 }
 0x2e6   : > { %1633 = vst [vmem:[%s214_s5] sm:$0xff] %v1632_v37 }
 0x2e7 PF: > { %s15_s15 = sadd.s32 1, %s1882_s15  }
 0x2e8   : > { %p12_p8 = scmp.ge.s32.totalorder %s15_s15, 4  }
 0x2ea   :  { %14 = sbr.rel (!%p12_p8) target bundleno = 1 (0x1), region = 74 }
 0x2ef   :  { %1653 = vsyncpa [#allocation3], 1 }
 0x2f0   :  { %1655 = vsyncpa [#allocation3 + $0x1], 1 }

</bundles_post_ra>
